<compile_context>
chip_gen: v5e
topology: v5e:2x2
jax: 0.10.0
libtpu: 0.0.40
codegen_flags: <defaults>
</compile_context>

<pallas_src>
import math
from functools import partial

import jax
import jax.numpy as jnp
from jax import lax
from jax.experimental import pallas as pl
from jax.experimental.pallas import tpu as pltpu

BN_EPS = 1e-5
VMEM_LIMIT = 48 * 1024 * 1024   # fits v5e/v6e (128 MiB) and v7x (64 MiB) VMEM


def _rnd(x, t):
    return ((x + t - 1) // t) * t


# ---------------------------------------------------------------------------
# Pallas kernel 1: single-shot matmul (full K per block) with fused
# per-column scale/bias (+ optional residual) and optional ReLU.
# Operands are bf16 (MXU native); accumulation and epilogue are f32.
# Covers every conv (via im2col) and every linear layer; BatchNorm (eval) is
# folded into scale/bias.
# ---------------------------------------------------------------------------
def _mm_kernel(a_ref, b_ref, s_ref, c_ref, o_ref, *, act):
    acc = jnp.dot(a_ref[...], b_ref[...], preferred_element_type=jnp.float32)
    out = acc * s_ref[...] + c_ref[...]
    if act == "relu":
        out = jnp.maximum(out, 0.0)
    o_ref[...] = out.astype(o_ref.dtype)


def _mm_res_kernel(a_ref, b_ref, s_ref, c_ref, r_ref, o_ref, *, act):
    acc = jnp.dot(a_ref[...], b_ref[...], preferred_element_type=jnp.float32)
    out = acc * s_ref[...] + c_ref[...] + r_ref[...].astype(jnp.float32)
    if act == "relu":
        out = jnp.maximum(out, 0.0)
    o_ref[...] = out.astype(o_ref.dtype)


def pallas_matmul(a, b, scale, bias, residual=None, act="none",
                  out_dtype=jnp.float32):
    """out = act((a @ b) * scale + bias [+ residual]); scale/bias per column."""
    M, K = a.shape
    N = b.shape[1]
    a = a.astype(jnp.bfloat16)
    b = b.astype(jnp.bfloat16)
    s = scale.reshape(1, N).astype(jnp.float32)
    c = bias.reshape(1, N).astype(jnp.float32)

    # Per-call tile selection: big M tiles, lane-exact N tiles, full K.
    tm = min(1024, _rnd(M, 8))
    tn = N if N < 256 else 256            # N is always a multiple of tn here
    grid = (pl.cdiv(M, tm), N // tn)

    in_specs = [pl.BlockSpec((tm, K), lambda i, j: (i, 0)),
                pl.BlockSpec((K, tn), lambda i, j: (0, j)),
                pl.BlockSpec((1, tn), lambda i, j: (0, j)),
                pl.BlockSpec((1, tn), lambda i, j: (0, j))]
    args = [a, b, s, c]
    if residual is None:
        kernel = partial(_mm_kernel, act=act)
    else:
        kernel = partial(_mm_res_kernel, act=act)
        in_specs.append(pl.BlockSpec((tm, tn), lambda i, j: (i, j)))
        args.append(residual.reshape(M, N))

    return pl.pallas_call(
        kernel,
        out_shape=jax.ShapeDtypeStruct((M, N), out_dtype),
        grid_spec=pltpu.PrefetchScalarGridSpec(
            num_scalar_prefetch=0, grid=grid,
            in_specs=in_specs,
            out_specs=pl.BlockSpec((tm, tn), lambda i, j: (i, j))),
        compiler_params=pltpu.CompilerParams(
            dimension_semantics=("parallel", "parallel"),
            vmem_limit_bytes=VMEM_LIMIT),
    )(*args)


# ---------------------------------------------------------------------------
# im2col glue (plain JAX: pure data movement, no FLOPs).  Runs inside the
# jitted conv wrappers so the strided slices fuse into the concat, and the
# patches are produced directly in bf16 with K already rounded to 128.
# TODO(synk): a halo-block direct conv (no im2col materialization) would cut
# the remaining kh*kw read amplification; im2col is kept for robustness.
# ---------------------------------------------------------------------------
def _append_k_pad(cols, K, dtype):
    if K > 128 and K % 128 != 0:
        pad = _rnd(K, 128) - K
        cols.append(jnp.zeros(cols[0].shape[:-1] + (pad,), dtype))
    return cols


def _im2col2d(x, kh, kw, stride, pad):
    N, H, W, C = x.shape
    xp = jnp.pad(x, ((0, 0), (pad, pad), (pad, pad), (0, 0)))
    Ho = (H + 2 * pad - kh) // stride + 1
    Wo = (W + 2 * pad - kw) // stride + 1
    cols = []
    for i in range(kh):
        for j in range(kw):
            cols.append(xp[:, i:i + (Ho - 1) * stride + 1:stride,
                           j:j + (Wo - 1) * stride + 1:stride, :])
    cols = _append_k_pad(cols, kh * kw * C, x.dtype)
    patches = jnp.concatenate(cols, axis=-1)            # (N,Ho,Wo, Kp)
    return patches.reshape(N * Ho * Wo, patches.shape[-1]), Ho, Wo


def _im2col3d(x, ksize, stride, pad):
    B, T, H, W, C = x.shape
    kt, kh, kw = ksize
    st, sh, sw = stride
    pt, ph, pw = pad
    xp = jnp.pad(x, ((0, 0), (pt, pt), (ph, ph), (pw, pw), (0, 0)))
    To = (T + 2 * pt - kt) // st + 1
    Ho = (H + 2 * ph - kh) // sh + 1
    Wo = (W + 2 * pw - kw) // sw + 1
    cols = []
    for a in range(kt):
        for i in range(kh):
            for j in range(kw):
                cols.append(xp[:, a:a + (To - 1) * st + 1:st,
                               i:i + (Ho - 1) * sh + 1:sh,
                               j:j + (Wo - 1) * sw + 1:sw, :])
    cols = _append_k_pad(cols, kt * kh * kw * C, x.dtype)
    patches = jnp.concatenate(cols, axis=-1)
    return patches.reshape(B * To * Ho * Wo, patches.shape[-1]), To, Ho, Wo


@partial(jax.jit, static_argnames=("stride", "pad", "act"))
def conv2d_bn(x, w, scale, shift, residual=None, *, stride=1, pad=1,
              act="none"):
    """Conv2d(bias=False) + folded BatchNorm (+residual, +act) via Pallas matmul."""
    Nimg = x.shape[0]
    co, ci, kh, kw = w.shape
    patches, Ho, Wo = _im2col2d(x.astype(jnp.bfloat16), kh, kw, stride, pad)
    wm = jnp.transpose(w, (2, 3, 1, 0)).reshape(kh * kw * ci, co)
    if patches.shape[1] != kh * kw * ci:
        wm = jnp.pad(wm, ((0, patches.shape[1] - kh * kw * ci), (0, 0)))
    res = None if residual is None else residual.reshape(-1, co)
    out = pallas_matmul(patches, wm, scale, shift, residual=res, act=act,
                        out_dtype=jnp.bfloat16)
    return out.reshape(Nimg, Ho, Wo, co)


# ---------------------------------------------------------------------------
# frontend3D + ResNet34 (pooling kept as cheap JAX glue)
# ---------------------------------------------------------------------------
# TODO(synk): MaxPool3d / AvgPool2d window reductions are kept in plain JAX
# (tiny 3x3 / 2x2 windows, not the hot path).
def _maxpool_hw(x, k=3, s=2, p=1):
    B, T, H, W, C = x.shape
    xp = jnp.pad(x, ((0, 0), (0, 0), (p, p), (p, p), (0, 0)),
                 constant_values=-jnp.inf)
    Ho = (H + 2 * p - k) // s + 1
    Wo = (W + 2 * p - k) // s + 1
    out = None
    for i in range(k):
        for j in range(k):
            sl = xp[:, :, i:i + (Ho - 1) * s + 1:s, j:j + (Wo - 1) * s + 1:s, :]
            out = sl if out is None else jnp.maximum(out, sl)
    return out


def _avgpool2(x):
    N, H, W, C = x.shape
    h2, w2 = H // 2, W // 2
    x = x[:, :h2 * 2, :w2 * 2, :].astype(jnp.float32)
    return x.reshape(N, h2, 2, w2, 2, C).mean(axis=(2, 4))


@jax.jit
def frontend3d(x_ndhwc, w3d, bn_s, bn_sh):
    B = x_ndhwc.shape[0]
    co = w3d.shape[0]
    patches, To, Ho, Wo = _im2col3d(x_ndhwc.astype(jnp.bfloat16),
                                    (5, 7, 7), (1, 2, 2), (2, 3, 3))
    wm = jnp.transpose(w3d, (2, 3, 4, 1, 0)).reshape(-1, co)
    if patches.shape[1] != wm.shape[0]:
        wm = jnp.pad(wm, ((0, patches.shape[1] - wm.shape[0]), (0, 0)))
    out = pallas_matmul(patches, wm, bn_s, bn_sh, act="relu",
                        out_dtype=jnp.bfloat16)        # conv + BN + ReLU
    out = out.reshape(B, To, Ho, Wo, co)
    return _maxpool_hw(out, 3, 2, 1)


def basic_block(x, p):
    if p["wd"] is not None:
        res = conv2d_bn(x, p["wd"], p["sd"], p["shd"],
                        stride=p["stride"], pad=0, act="none")
    else:
        res = x
    out = conv2d_bn(x, p["w1"], p["s1"], p["sh1"],
                    stride=p["stride"], pad=1, act="relu")
    out = conv2d_bn(out, p["w2"], p["s2"], p["sh2"], residual=res,
                    stride=1, pad=1, act="relu")
    return out


def resnet_forward(x, P):
    for layer in P["resnet"]:
        for blk in layer:
            x = basic_block(x, blk)
    x = _avgpool2(x)
    N = x.shape[0]
    # flatten in torch NCHW order
    x = jnp.transpose(x, (0, 3, 1, 2)).reshape(N, -1)           # (N, 512)
    # fc(512,512) followed by BatchNorm1d(512), fused into one matmul epilogue
    scale = P["bnfc_s"]
    bias = P["fc_b"] * scale + P["bnfc_sh"]
    return pallas_matmul(x, P["fc_w"].T, scale, bias, act="none",
                         out_dtype=jnp.float32)


# ---------------------------------------------------------------------------
# Pallas kernel 2: fused PositionalEncoding-add + ADDSTCN / DepthwiseNet head
# (attention scaling, 3 causal depthwise conv-k2 blocks with PReLU, and the
#  LastBlock channel-mixing Linear(75,75)).
# ---------------------------------------------------------------------------
def _tcn_kernel(x_ref, pe_ref, att_ref,
                w1_ref, b1_ref, a1_ref,
                w2_ref, b2_ref, a2_ref,
                w3_ref, b3_ref, wl_ref, bl_ref, o_ref):
    x = x_ref[0]                          # (C=75, L=512)
    pe = pe_ref[0]                        # (1, L)
    # NOTE: matches PyTorch PositionalEncoding applied to (B, 75, 512): pe is
    # indexed by batch position and broadcast over all 75 "time" rows.
    h = (x + pe) * att_ref[...]           # pos-enc add, then * softmax(attention)
    col = lax.broadcasted_iota(jnp.int32, h.shape, 1)

    def causal_dw(v, w_ref, b_ref, d):
        # shifted[:, t] = v[:, t - d]   (zero for t < d)  -> causal kernel-2 conv
        shifted = jnp.where(col < d, 0.0, pltpu.roll(v, shift=d, axis=1))
        return w_ref[:, 1:2] * v + w_ref[:, 0:1] * shifted + b_ref[...]

    def prelu(v, a_ref):
        return jnp.where(v >= 0.0, v, a_ref[...] * v)

    h1 = prelu(causal_dw(h, w1_ref, b1_ref, 1), a1_ref)            # FirstBlock
    h2 = prelu(causal_dw(h1, w2_ref, b2_ref, 2) + h1, a2_ref)      # TemporalBlock
    z = causal_dw(h2, w3_ref, b3_ref, 4) + h2                      # LastBlock conv+res
    y = jnp.dot(wl_ref[...], z, preferred_element_type=jnp.float32) + bl_ref[...]
    o_ref[0, :, :] = y


def tcn_forward(x, pe_b, p):
    B, C, L = x.shape
    att = jax.nn.softmax(p["fs_attention"], axis=0)                # (C, 1)
    ins = (x.astype(jnp.float32), pe_b, att,
           p["w1"], p["b1"], p["a1"],
           p["w2"], p["b2"], p["a2"],
           p["w3"], p["b3"], p["wl"], p["bl"])
    in_specs = [pl.BlockSpec((1, C, L), lambda b: (b, 0, 0)),
                pl.BlockSpec((1, 1, L), lambda b: (b, 0, 0))]
    in_specs += [pl.BlockSpec(t.shape, lambda b, nd=t.ndim: (0,) * nd)
                 for t in ins[2:]]
    return pl.pallas_call(
        _tcn_kernel,
        out_shape=jax.ShapeDtypeStruct((B, C, L), jnp.float32),
        grid_spec=pltpu.PrefetchScalarGridSpec(
            num_scalar_prefetch=0, grid=(B,),
            in_specs=in_specs,
            out_specs=pl.BlockSpec((1, C, L), lambda b: (b, 0, 0))),
        compiler_params=pltpu.CompilerParams(
            dimension_semantics=("parallel",)),
    )(*ins)


# ---------------------------------------------------------------------------
# Parameters (deterministic, shapes taken from the PyTorch __init__)
# ---------------------------------------------------------------------------
def _bn_fold(c):
    gamma = jnp.ones((c,), jnp.float32)
    beta = jnp.zeros((c,), jnp.float32)
    mean = jnp.zeros((c,), jnp.float32)
    var = jnp.ones((c,), jnp.float32)
    scale = gamma / jnp.sqrt(var + BN_EPS)
    return scale, beta - mean * scale


def init_params(key, frame_len=75, input_dim=512, n_classes=28):
    ks = iter(jax.random.split(key, 256))

    def nrm(shape, std=0.05):
        return std * jax.random.normal(next(ks), shape, dtype=jnp.float32)

    P = {}
    # frontend3D: Conv3d(1,64,(5,7,7),s=(1,2,2),p=(2,3,3),bias=False)+BN3d+ReLU+MaxPool3d
    P["w3d"] = nrm((64, 1, 5, 7, 7))
    P["bn3d_s"], P["bn3d_sh"] = _bn_fold(64)

    # ResNet34: BasicBlock, layers [3,4,6,3], planes (64,128,256,256)
    cfg = [(64, 3, 1), (128, 4, 2), (256, 6, 2), (256, 3, 2)]
    inplanes, resnet = 64, []
    for planes, blocks, stride in cfg:
        layer = []
        for bi in range(blocks):
            st = stride if bi == 0 else 1
            blk = {"stride": st,
                   "w1": nrm((planes, inplanes, 3, 3)),
                   "w2": nrm((planes, planes, 3, 3))}
            blk["s1"], blk["sh1"] = _bn_fold(planes)
            blk["s2"], blk["sh2"] = _bn_fold(planes)
            if st != 1 or inplanes != planes:
                blk["wd"] = nrm((planes, inplanes, 1, 1))
                blk["sd"], blk["shd"] = _bn_fold(planes)
            else:
                blk["wd"] = None
            inplanes = planes
            layer.append(blk)
        resnet.append(layer)
    P["resnet"] = resnet
    P["fc_w"] = nrm((512, 512), 0.02)            # ResNet.fc
    P["fc_b"] = nrm((512,), 0.01)
    P["bnfc_s"], P["bnfc_sh"] = _bn_fold(512)    # ResNet.bnfc

    # ADDSTCN(75, num_levels=3, kernel=2, dilation_c=2)
    C = frame_len
    P["tcn"] = {
        "fs_attention": jnp.ones((C, 1), jnp.float32),
        "w1": nrm((C, 2), 0.1), "b1": nrm((C, 1), 0.01),
        "a1": 0.25 * jnp.ones((C, 1), jnp.float32),
        "w2": nrm((C, 2), 0.1), "b2": nrm((C, 1), 0.01),
        "a2": 0.25 * jnp.ones((C, 1), jnp.float32),
        "w3": nrm((C, 2), 0.1), "b3": nrm((C, 1), 0.01),
        "wl": nrm((C, C), 0.01), "bl": nrm((C, 1), 0.01),
    }
    # Lipreading.fc : Linear(512, 28)
    P["fc2_w"] = nrm((n_classes, input_dim), 0.02)
    P["fc2_b"] = nrm((n_classes,), 0.01)
    return P


def make_pe(B, d=512):
    position = jnp.arange(B, dtype=jnp.float32)[:, None]
    div_term = jnp.exp(jnp.arange(0, d, 2, dtype=jnp.float32)
                       * (-math.log(10000.0) / d))
    pe = jnp.zeros((B, 1, d), jnp.float32)
    pe = pe.at[:, 0, 0::2].set(jnp.sin(position * div_term))
    pe = pe.at[:, 0, 1::2].set(jnp.cos(position * div_term))
    return pe


# ---------------------------------------------------------------------------
# Full Lipreading forward
# ---------------------------------------------------------------------------
def lipreading_forward(x, P, frame_len=75, input_dim=512, n_classes=28):
    # x: (B, 1, T, H, W) as in PyTorch (NCDHW)
    B = x.shape[0]
    xd = jnp.transpose(x, (0, 2, 3, 4, 1)).astype(jnp.float32)   # NDHWC
    f = frontend3d(xd, P["w3d"], P["bn3d_s"], P["bn3d_sh"])      # (B,T,H',W',64) bf16
    T = f.shape[1]
    frames = f.reshape(B * T, f.shape[2], f.shape[3], 64)        # == view(-1,64,H,W)
    feats = resnet_forward(frames, P)                            # (B*T, 512) f32
    seq = feats.reshape(B, frame_len, input_dim)                 # (B, 75, 512)
    pe_b = make_pe(B, input_dim)                                 # x + pe[:B]  (in kernel)
    y = tcn_forward(seq, pe_b, P["tcn"])                         # (B, 75, 512)
    logits = pallas_matmul(y.reshape(B * frame_len, input_dim), P["fc2_w"].T,
                           jnp.ones((n_classes,), jnp.float32), P["fc2_b"],
                           act="none", out_dtype=jnp.float32)
    return logits.reshape(B, frame_len, n_classes)


if __name__ == "__main__":
    key = jax.random.PRNGKey(0)
    pkey, xkey = jax.random.split(key)
    params = init_params(pkey)

    # Smallest input consistent with the module:
    #   T = frameLen = 75  (forced by x.view(-1, 75, 512) and ADDSTCN(75,...))
    #   H = 33, W = 97     (so ResNet's flatten yields exactly 512 features
    #                       for fc = Linear(512, 512))
    B, T, H, W = 1, 75, 33, 97
    x = jax.random.normal(xkey, (B, 1, T, H, W), dtype=jnp.float32)

    out = lipreading_forward(x, params)
    out = jax.block_until_ready(out)
    assert out.shape == (B, T, 28), out.shape
    assert bool(jnp.all(jnp.isfinite(out)))
    print("KERNEL_OK")
</pallas_src>

<mosaic_0001>
module attributes {stable_mosaic.version = 11 : i64} {
  func.func @_mm_kernel(%arg0: i32, %arg1: i32, %arg2: memref<1024x256xbf16, #tpu.memory_space<vmem>>, %arg3: memref<256x64xbf16, #tpu.memory_space<vmem>>, %arg4: memref<1x64xf32, #tpu.memory_space<vmem>>, %arg5: memref<1x64xf32, #tpu.memory_space<vmem>>, %arg6: memref<1024x64xbf16, #tpu.memory_space<vmem>>) attributes {dimension_semantics = [#tpu.dimension_semantics<parallel>, #tpu.dimension_semantics<parallel>], iteration_bounds = array<i64: 62, 1>, scalar_prefetch = 0 : i64, scratch_operands = 0 : i64, tpu.core_type = #tpu.core_type<tc>, window_params = [{transform_indices = @transform_0, window_bounds = array<i64: 1024, 256>}, {transform_indices = @transform_1, window_bounds = array<i64: 256, 64>}, {transform_indices = @transform_2, window_bounds = array<i64: 1, 64>}, {transform_indices = @transform_3, window_bounds = array<i64: 1, 64>}, {transform_indices = @transform_4, window_bounds = array<i64: 1024, 64>}]} {
    %c0 = arith.constant 0 : index
    %c0_0 = arith.constant 0 : index
    %0 = vector.load %arg2[%c0, %c0_0] : memref<1024x256xbf16, #tpu.memory_space<vmem>>, vector<1024x256xbf16>
    %c0_1 = arith.constant 0 : index
    %c0_2 = arith.constant 0 : index
    %1 = vector.load %arg3[%c0_1, %c0_2] : memref<256x64xbf16, #tpu.memory_space<vmem>>, vector<256x64xbf16>
    %cst = arith.constant dense<0.000000e+00> : vector<1024x64xf32>
    %2 = tpu.matmul %0, %1, %cst {dimension_numbers = #tpu.dot_dimension_numbers<[1], [0], [0], [1], [0, 0, 1, 1], [], []>} : vector<1024x256xbf16>, vector<256x64xbf16>, vector<1024x64xf32> -> vector<1024x64xf32>
    %c0_3 = arith.constant 0 : index
    %c0_4 = arith.constant 0 : index
    %3 = vector.load %arg4[%c0_3, %c0_4] : memref<1x64xf32, #tpu.memory_space<vmem>>, vector<1x64xf32>
    %4 = vector.broadcast %3 : vector<1x64xf32> to vector<1024x64xf32>
    %5 = arith.mulf %2, %4 : vector<1024x64xf32>
    %c0_5 = arith.constant 0 : index
    %c0_6 = arith.constant 0 : index
    %6 = vector.load %arg5[%c0_5, %c0_6] : memref<1x64xf32, #tpu.memory_space<vmem>>, vector<1x64xf32>
    %7 = vector.broadcast %6 : vector<1x64xf32> to vector<1024x64xf32>
    %8 = arith.addf %5, %7 : vector<1024x64xf32>
    %cst_7 = arith.constant 0.000000e+00 : f32
    %9 = vector.broadcast %cst_7 : f32 to vector<1024x64xf32>
    %10 = arith.maximumf %8, %9 : vector<1024x64xf32>
    %11 = arith.truncf %10 : vector<1024x64xf32> to vector<1024x64xbf16>
    %c0_8 = arith.constant 0 : index
    %c0_9 = arith.constant 0 : index
    %12 = vector.load %arg6[%c0_8, %c0_9] : memref<1024x64xbf16, #tpu.memory_space<vmem>>, vector<1024x64xbf16>
    tpu.vector_store %arg6[%c0_8, %c0_9], %11 {strides = array<i32>} : memref<1024x64xbf16, #tpu.memory_space<vmem>>, vector<1024x64xbf16>,
    return
  }
  func.func @transform_0(%arg0: i32, %arg1: i32) -> (i32, i32) {
    %c0_i32 = arith.constant 0 : i32
    %c0_i32_0 = arith.constant 0 : i32
    return %arg0, %c0_i32 : i32, i32
  }
  func.func @transform_1(%arg0: i32, %arg1: i32) -> (i32, i32) {
    %c0_i32 = arith.constant 0 : i32
    %c0_i32_0 = arith.constant 0 : i32
    return %c0_i32, %arg1 : i32, i32
  }
  func.func @transform_2(%arg0: i32, %arg1: i32) -> (i32, i32) {
    %c0_i32 = arith.constant 0 : i32
    %c0_i32_0 = arith.constant 0 : i32
    return %c0_i32, %arg1 : i32, i32
  }
  func.func @transform_3(%arg0: i32, %arg1: i32) -> (i32, i32) {
    %c0_i32 = arith.constant 0 : i32
    %c0_i32_0 = arith.constant 0 : i32
    return %c0_i32, %arg1 : i32, i32
  }
  func.func @transform_4(%arg0: i32, %arg1: i32) -> (i32, i32) {
    %c0_i32 = arith.constant 0 : i32
    return %arg0, %arg1 : i32, i32
  }
}

</mosaic_0001>

<bundles_post_ra>
// kernel: frontend3d.1
= control target key start
LH: loop header
LB: loop body
LE: loop exit
PB: predicated region body
PF: predicated region fallthrough
CT: control target
= control target key end

     0   :  { %9 = vsyncpa [#allocation3], 0  ;;  %s5084_s0 = inlined_call_operand.hbm [shape: bf16[62475,256], index: 0, kind: input, shape index: {}]   ;;  %s5085_s1 = inlined_call_operand.vmem [shape: bf16[256,64], index: 1, kind: input, shape index: {}]   ;;  %s5086_s2 = inlined_call_operand.vmem [shape: f32[1,64], index: 2, kind: input, shape index: {}]   ;;  %s5087_s3 = inlined_call_operand.vmem [shape: f32[1,64], index: 3, kind: input, shape index: {}]   ;;  %s5088_s4 = inlined_call_operand.vmem [shape: bf16[62475,64], index: 4, kind: output, shape index: {}]  }
   0x1   :  { %11 = vsyncpa [#allocation3 + $0x1], 0  ;;  %s3979_s15 = smov 0   ;;  %s3981_s16 = smov 0  }
   0x2   :  { %s3983_s17 = smov 0   ;;  %s3985_s18 = smov 0  }
   0x3   :  { %s3987_s19 = smov 0   ;;  %s3989_s20 = smov 0  }
   0x4 LB: > { %s2897_s21 = sadd.s32 4294967295, %s3917_s20   ;;  %s29_s22 = sadd.s32 1, %s3913_s19  ;;  %s3917_s20 = sphi %s3989_s20, %s17_s20   ;;  %s3913_s19 = sphi %s3987_s19, %s5101_s19   ;;  %s3909_s18 = sphi %s3985_s18, %s5100_s18   ;;  %s3905_s17 = sphi %s3983_s17, %s5099_s17   ;;  %s3901_s16 = sphi %s3981_s16, %s5098_s16   ;;  %s3897_s15 = sphi %s3979_s15, %s5097_s15  }
   0x5   : > { %p31_p0 = scmp.ge.s32.totalorder %s29_s22, 62  ;;  %s36_s23 = sadd.s32 1, %s3905_s17 }
   0x6   : > { %p43_p1 = scmp.ne.s32.totalorder %s3905_s17, %s3901_s16  ;;  %p44_p2 = scmp.eq.s32.totalorder %s3917_s20, 0 }
   0x7   : > { %s5103_s22 = smov (%p31_p0, %s29_s22), 0  ;;  %p49_p4 = scmp.ne.s32.totalorder %s3901_s16, %s3897_s15 }
   0x8   : > { %p45_p3 = por %p44_p2, %p43_p1  ;;  %s33_s24 = ssub.s32 %s3913_s19, %s5103_s22 }
   0x9   : > { %p50_p5 = scmp.eq.s32.totalorder %s2897_s21, 0  ;;  %p34_p6 = scmp.eq.s32.totalorder %s33_s24, 0 }
   0xa   : > { %p153_p7 = scmp.eq.s32.totalorder %s2897_s21, 61  ;;  %p2903_p10 = scmp.ge.s32.totalorder %s3917_s20, 62 }
   0xb   : > { %p4018_p8 = por %p50_p5, %p49_p4 }
   0xc   : > { %s4023_s26 = scalar_select %p34_p6, %s3905_s17, %s36_s23  }
   0xd   : > { %p4025_p9 = por %p153_p7, %p43_p1  ;;  %194 = sbr.rel (%p2903_p10) target bundleno = 54 (0x36), region = 28 }
  0x12   : > { %197 = sbr.rel (!%p45_p3) target bundleno = 54 (0x36), region = 32  ;;  %s198_s28 = sand.u32 (%p45_p3), 1, %s3905_s17  }
  0x13   : > { %s2905_s29 = sshll.u32 (%p45_p3), %s3913_s19, 7  ;;  %s2904_s30 = sshll.u32 (%p45_p3), %s198_s28, 10 }
  0x14   : > { %s204_s5 = ssub.s32 (%p45_p3), 7810, %s2905_s29  ;;  %s4035_s9 = scalar_lea.sflag (%p45_p3), [#allocation3], %s198_s28 }
  0x15   : > { %p205_p11 = scmp.lt.s32.totalorder (%p45_p3), %s204_s5, 128  ;;  %s202_s10 = scalar_lea.vmem (%p45_p3), [#allocation2], %s2904_s30 }
  0x17   : > { %s5105_s5 = smov (!%p205_p11, %s204_s5), 128 }
  0x18   : > { %s3509_s6 = sshll.u32 %s5105_s5, 3 }
  0x19   : > { %s209_s7 = ssub.s32 1024, %s3509_s6 }
  0x1a   : > { %s210_s8 = sshll.u32 %s209_s7, 4 }
  0x1b   : > { %211 = vsyncadd %s4035_s9, %s210_s8  ;;  %p4038_p12 = scmp.ne.s32.totalorder %s3509_s6, 0  ;;  %s3511_s12 = sshll.u32 %s3913_s19, 10 }
  0x1c   : > { %s215_s15 = scalar_lea.hbm %s5084_s0, %s3511_s12  ;;  %s4046_s21 = sshll.u32 %s202_s10, 4  ;;  %s220_s21 = int_to_ptr.vmem [resolvable:$true] %s4046_s21 }
  0x1d   : > { %s217_s23 = sshll.u32 %s215_s15, 4  ;;  %s2912_s24 = sshll.u32 %s5105_s5, 7  ;;  %s4049_s23 = int_to_ptr.hbm [resolvable:$true] %s217_s23 }
  0x1e   : > { %s3796_s28 = sshra.s32 %s4049_s23, 4  ;;  %s3798_s29 = sshrl.u32 %s2912_s24, 4  ;;  %s3797_s28 = int_to_ptr.hbm [resolvable:$true] %s3796_s28 }
  0x1f   : > { %s3803_s30 = scalar_lea.hbm %s3797_s28, %s3798_s29  ;;  %s3807_s8 = scalar_lea.hbm %s5084_s0, 62480 }
  0x20   : > { %p3804_p13 = scmp.ne.s32.totalorder %s3797_s28, %s3803_s30  ;;  %p3809_p2 = scmp.lt.s32.totalorder %s3807_s8, %s3803_s30 }
  0x22   : > { %p3805_p0 = pnand %p3804_p13, %p4038_p12 }
  0x24   : > { %p3806_p1 = pneg %p3805_p0 }
  0x26   : > { %p3811_p3 = pnand %p3809_p2, %p3806_p1 }
  0x28   : > { %3814 = shalt.err (!%p3811_p3)
}
  0x29   : > { %s3815_s10 = sshra.s32 %s220_s21, 4  ;;  %s3951_s13 = smov [#allocation2]   ;;  %s3816_s10 = int_to_ptr.vmem [resolvable:$true] %s3815_s10 }
  0x2a   : > { %s3822_s12 = scalar_lea.vmem %s3816_s10, %s3798_s29  ;;  %s3826_s14 = scalar_lea.vmem %s3951_s13, 2048 }
  0x2b   : > { %p3823_p4 = scmp.ne.s32.totalorder %s3816_s10, %s3822_s12  ;;  %p3828_p7 = scmp.lt.s32.totalorder %s3826_s14, %s3822_s12 }
  0x2d   : > { %p3824_p5 = pnand %p3823_p4, %p4038_p12 }
  0x2f   : > { %p3825_p6 = pneg %p3824_p5 }
  0x31   : > { %p3830_p10 = pnand %p3828_p7, %p3825_p6 }
  0x33   : > { %3833 = shalt.err (!%p3830_p10)
}
  0x34   : > { %s3952_s15 = smov 128   ;;  %s3953_s28 = smov 8  }
  0x35   : > { %225 = dma.hbm_to_vmem [thread:$0]  (%p4038_p12), %s4049_s23, %s2912_s24, %s220_s21, %s4035_s9, %s3952_s15, %s3952_s15, %s3953_s28  }
  0x36 PF: > { %p2913_p11 = scmp.ge.s32.totalorder %s3917_s20, 1  ;;  %p227_p13 = scmp.lt.s32.totalorder %s3917_s20, 63 }
  0x38   : > { %p228_p0 = pnand %p2913_p11, %p227_p13 }
  0x39   : > { %s4075_s29 = sand.u32 (!%p228_p0), 1, %s3901_s16  }
  0x3a   : > { %231 = sbr.rel (%p228_p0) target bundleno = 808 (0x328), region = 36  ;;  %s2914_s30 = sshll.u32 (!%p228_p0), %s4075_s29, 10 }
  0x3b   : > { %s234_s6 = scalar_lea.sflag (!%p228_p0), [#allocation3], %s4075_s29  ;;  %s4079_s11 = scalar_lea.vmem (!%p228_p0), [#allocation2], %s2914_s30 }
  0x3f   : > { %3892 = dma.done.wait (%p4018_p8), %s234_s6, 16384  }
  0x40   : > { %3894 = vsyncadd (%p4018_p8), %s234_s6, 4294950912  ;;  %v3647_v0 = vld [vmem:[%s5085_s1 + $0x38] sm:$0xff]  ;;  %v3646_v2 = vld [vmem:[%s5085_s1 + $0x30] sm:$0xff]  ;;  %s2915_s24 = sshll.u32 %s4075_s29, 9  ;;  %vm2367_vm0 = vcmask 519168   ;;  %s3656_s28 = sshll.u32 (%p4025_p9), %s3909_s18, 9 }
  0x41   : > { %v3655_v1 = vld [vmem:[%s5085_s1 + $0x78] sm:$0xff]  ;;  %1189 = vmatpush.bf16.msra.mxu0 %v3647_v0  ;;  %3659 = vmatpush.bf16.msra.mxu2 %v3647_v0  ;;  %v3654_v3 = vld [vmem:[%s5085_s1 + $0x70] sm:$0xff]  ;;  %v3645_v4 = vld [vmem:[%s5085_s1 + $0x28] sm:$0xff]  ;;  %s4223_s29 = scalar_lea.vmem [#allocation4], %s2915_s24   ;;  %s4941_s9 = scalar_lea.vmem (%p4025_p9), %s5088_s4, %s3656_s28  }
  0x42   : > { %1518 = vmatpush.bf16.msra.mxu1 %v3655_v1  ;;  %3667 = vmatpush.bf16.msra.mxu3 %v3655_v1  ;;  %v3653_v5 = vld [vmem:[%s5085_s1 + $0x68] sm:$0xff]  ;;  %v3644_v6 = vld [vmem:[%s5085_s1 + $0x20] sm:$0xff]  ;;  %v3643_v8 = vld [vmem:[%s5085_s1 + $0x18] sm:$0xff] }
  0x43   : > { %v3652_v7 = vld [vmem:[%s5085_s1 + $0x60] sm:$0xff]  ;;  %v3651_v9 = vld [vmem:[%s5085_s1 + $0x58] sm:$0xff]  ;;  %v3642_v10 = vld [vmem:[%s5085_s1 + $0x10] sm:$0xff] }
  0x44   : > { %v3650_v11 = vld [vmem:[%s5085_s1 + $0x50] sm:$0xff]  ;;  %v3641_v12 = vld [vmem:[%s5085_s1 + $0x8] sm:$0xff]  ;;  %v3640_v14 = vld [vmem:[%s5085_s1] sm:$0xff] }
  0x45   : > { %1190 = vmatpush.bf16.msra.mxu0 %v3646_v2  ;;  %3660 = vmatpush.bf16.msra.mxu2 %v3646_v2  ;;  %v3649_v13 = vld [vmem:[%s5085_s1 + $0x48] sm:$0xff]  ;;  %v3648_v15 = vld [vmem:[%s5085_s1 + $0x40] sm:$0xff]  ;;  %v2918_v16 = vld [vmem:[%s4079_s11] sm:$0xf] }
  0x46   : > { %1519 = vmatpush.bf16.msra.mxu1 %v3654_v3  ;;  %3668 = vmatpush.bf16.msra.mxu3 %v3654_v3  ;;  %v3513_v17 = vld [vmem:[%s4079_s11 + $0x4] sm:$0xf0]  ;;  %v3174_v18 = vld [vmem:[%s4079_s11 + $0x200] sm:$0xf]  ;;  %v3512_v20 = vld [vmem:[%s4079_s11 + $0x4] sm:$0xf] }
  0x47   : > { %v3577_v19 = vld [vmem:[%s4079_s11 + $0x204] sm:$0xf0]  ;;  %v2920_v21 = vld [vmem:[%s4079_s11 + $0x8] sm:$0xf0]  ;;  %v3576_v22 = vld [vmem:[%s4079_s11 + $0x204] sm:$0xf]  ;;  %v2919_v24 = vor.u32 %v3513_v17, %v2918_v16 }
  0x48   : > { %v3176_v23 = vld [vmem:[%s4079_s11 + $0x208] sm:$0xf0]  ;;  %v3175_v25 = vor.u32 %v3577_v19, %v3174_v18  ;;  %v2923_v26 = vor.u32 %v3512_v20, %v2920_v21  ;;  %v2926_v28 = vld [vmem:[%s4079_s11 + $0x10] sm:$0xf]  ;;  %v3515_v29 = vld [vmem:[%s4079_s11 + $0x14] sm:$0xf0] }
  0x49   : > { %1191 = vmatpush.bf16.msra.mxu0 %v3645_v4  ;;  %3661 = vmatpush.bf16.msra.mxu2 %v3645_v4  ;;  %v3179_v27 = vor.u32 %v3576_v22, %v3176_v23  ;;  %v3182_v30 = vld [vmem:[%s4079_s11 + $0x210] sm:$0xf]  ;;  %v3579_v31 = vld [vmem:[%s4079_s11 + $0x214] sm:$0xf0]  ;;  %v3514_v32 = vld [vmem:[%s4079_s11 + $0x14] sm:$0xf]  ;;  %v2927_v36 = vor.u32 %v3515_v29, %v2926_v28 }
  0x4a   : > { %1520 = vmatpush.bf16.msra.mxu1 %v3653_v5  ;;  %3669 = vmatpush.bf16.msra.mxu3 %v3653_v5  ;;  %v2928_v33 = vld [vmem:[%s4079_s11 + $0x18] sm:$0xf0]  ;;  %v3578_v34 = vld [vmem:[%s4079_s11 + $0x214] sm:$0xf]  ;;  %v3183_v37 = vor.u32 %v3579_v31, %v3182_v30  ;;  %v2934_v40 = vld [vmem:[%s4079_s11 + $0x20] sm:$0xf] }
  0x4b   : > { %v3184_v35 = vld [vmem:[%s4079_s11 + $0x218] sm:$0xf0]  ;;  %v2931_v38 = vor.u32 %v3514_v32, %v2928_v33  ;;  %v3517_v41 = vld [vmem:[%s4079_s11 + $0x24] sm:$0xf0]  ;;  %v3190_v42 = vld [vmem:[%s4079_s11 + $0x220] sm:$0xf] }
  0x4c   : > { %v3187_v39 = vor.u32 %v3578_v34, %v3184_v35  ;;  %v3581_v43 = vld [vmem:[%s4079_s11 + $0x224] sm:$0xf0]  ;;  %v3516_v44 = vld [vmem:[%s4079_s11 + $0x24] sm:$0xf]  ;;  %v2936_v45 = vld [vmem:[%s4079_s11 + $0x28] sm:$0xf0]  ;;  %v2935_v48 = vor.u32 %v3517_v41, %v2934_v40 }
  0x4d   : > { %1192 = vmatpush.bf16.msra.mxu0 %v3644_v6  ;;  %3662 = vmatpush.bf16.msra.mxu2 %v3644_v6  ;;  %v3580_v46 = vld [vmem:[%s4079_s11 + $0x224] sm:$0xf]  ;;  %v3192_v47 = vld [vmem:[%s4079_s11 + $0x228] sm:$0xf0]  ;;  %v3191_v49 = vor.u32 %v3581_v43, %v3190_v42  ;;  %v2939_v50 = vor.u32 %v3516_v44, %v2936_v45  ;;  %v2942_v52 = vld [vmem:[%s4079_s11 + $0x30] sm:$0xf] }
  0x4e   : > { %1521 = vmatpush.bf16.msra.mxu1 %v3652_v7  ;;  %3670 = vmatpush.bf16.msra.mxu3 %v3652_v7  ;;  %v3195_v51 = vor.u32 %v3580_v46, %v3192_v47  ;;  %v3519_v53 = vld [vmem:[%s4079_s11 + $0x34] sm:$0xf0]  ;;  %v3198_v54 = vld [vmem:[%s4079_s11 + $0x230] sm:$0xf]  ;;  %v3518_v56 = vld [vmem:[%s4079_s11 + $0x34] sm:$0xf] }
  0x4f   : > { %v3583_v55 = vld [vmem:[%s4079_s11 + $0x234] sm:$0xf0]  ;;  %v2944_v57 = vld [vmem:[%s4079_s11 + $0x38] sm:$0xf0]  ;;  %v3582_v58 = vld [vmem:[%s4079_s11 + $0x234] sm:$0xf]  ;;  %v2943_v60 = vor.u32 %v3519_v53, %v2942_v52 }
  0x50   : > { %v3200_v59 = vld [vmem:[%s4079_s11 + $0x238] sm:$0xf0]  ;;  %v3199_v61 = vor.u32 %v3583_v55, %v3198_v54  ;;  %v2947_v62 = vor.u32 %v3518_v56, %v2944_v57  ;;  %v2950_v0 = vld [vmem:[%s4079_s11 + $0x40] sm:$0xf]  ;;  %v3521_v1 = vld [vmem:[%s4079_s11 + $0x44] sm:$0xf0] }
  0x51   : > { %1193 = vmatpush.bf16.msra.mxu0 %v3643_v8  ;;  %3663 = vmatpush.bf16.msra.mxu2 %v3643_v8  ;;  %v3203_v63 = vor.u32 %v3582_v58, %v3200_v59  ;;  %v3206_v2 = vld [vmem:[%s4079_s11 + $0x240] sm:$0xf]  ;;  %v3585_v3 = vld [vmem:[%s4079_s11 + $0x244] sm:$0xf0]  ;;  %v3520_v4 = vld [vmem:[%s4079_s11 + $0x44] sm:$0xf]  ;;  %v2951_v8 = vor.u32 %v3521_v1, %v2950_v0 }
  0x52   : > { %1522 = vmatpush.bf16.msra.mxu1 %v3651_v9  ;;  %3671 = vmatpush.bf16.msra.mxu3 %v3651_v9  ;;  %v2952_v5 = vld [vmem:[%s4079_s11 + $0x48] sm:$0xf0]  ;;  %v3584_v6 = vld [vmem:[%s4079_s11 + $0x244] sm:$0xf]  ;;  %v3207_v9 = vor.u32 %v3585_v3, %v3206_v2  ;;  %v3522_v16 = vld [vmem:[%s4079_s11 + $0x54] sm:$0xf] }
  0x53   : > { %v3208_v7 = vld [vmem:[%s4079_s11 + $0x248] sm:$0xf0]  ;;  %v2960_v17 = vld [vmem:[%s4079_s11 + $0x58] sm:$0xf0]  ;;  %v3586_v18 = vld [vmem:[%s4079_s11 + $0x254] sm:$0xf] }
  0x54   : > { %v3216_v19 = vld [vmem:[%s4079_s11 + $0x258] sm:$0xf0]  ;;  %v2963_v22 = vor.u32 %v3522_v16, %v2960_v17  ;;  %v3524_v28 = vld [vmem:[%s4079_s11 + $0x64] sm:$0xf]  ;;  %v2968_v29 = vld [vmem:[%s4079_s11 + $0x68] sm:$0xf0] }
  0x55   : > { %1194 = vmatpush.bf16.msra.mxu0 %v3642_v10  ;;  %3664 = vmatpush.bf16.msra.mxu2 %v3642_v10  ;;  %v2955_v10 = vor.u32 %v3520_v4, %v2952_v5  ;;  %v3219_v23 = vor.u32 %v3586_v18, %v3216_v19  ;;  %v3588_v30 = vld [vmem:[%s4079_s11 + $0x264] sm:$0xf]  ;;  %v3224_v31 = vld [vmem:[%s4079_s11 + $0x268] sm:$0xf0]  ;;  %v2971_v34 = vor.u32 %v3524_v28, %v2968_v29  ;;  %v3526_v40 = vld [vmem:[%s4079_s11 + $0x74] sm:$0xf] }
  0x56   : > { %1523 = vmatpush.bf16.msra.mxu1 %v3650_v11  ;;  %3672 = vmatpush.bf16.msra.mxu3 %v3650_v11  ;;  %v3211_v11 = vor.u32 %v3584_v6, %v3208_v7  ;;  %v3227_v35 = vor.u32 %v3588_v30, %v3224_v31  ;;  %v2976_v41 = vld [vmem:[%s4079_s11 + $0x78] sm:$0xf0]  ;;  %v3590_v42 = vld [vmem:[%s4079_s11 + $0x274] sm:$0xf]  ;;  %v3528_v52 = vld [vmem:[%s4079_s11 + $0x84] sm:$0xf] }
  0x57   : > { %v3232_v43 = vld [vmem:[%s4079_s11 + $0x278] sm:$0xf0]  ;;  %v2979_v46 = vor.u32 %v3526_v40, %v2976_v41  ;;  %v2984_v53 = vld [vmem:[%s4079_s11 + $0x88] sm:$0xf0]  ;;  %v3592_v54 = vld [vmem:[%s4079_s11 + $0x284] sm:$0xf] }
  0x58   : > { %v3235_v47 = vor.u32 %v3590_v42, %v3232_v43  ;;  %v3240_v55 = vld [vmem:[%s4079_s11 + $0x288] sm:$0xf0]  ;;  %v4208_v59 = vld [vmem:[%s5086_s2] ss:$0 sm:$0xff]  ;;  %v3530_v18 = vld [vmem:[%s4079_s11 + $0x94] sm:$0xf] }
  0x59   : > { %1195 = vmatpush.bf16.msra.mxu0 %v3641_v12  ;;  %3665 = vmatpush.bf16.msra.mxu2 %v3641_v12  ;;  %v2958_v12 = vld [vmem:[%s4079_s11 + $0x50] sm:$0xf]  ;;  %v2992_v19 = vld [vmem:[%s4079_s11 + $0x98] sm:$0xf0] }
  0x5a   : > { %1524 = vmatpush.bf16.msra.mxu1 %v3649_v13  ;;  %3673 = vmatpush.bf16.msra.mxu3 %v3649_v13  ;;  %v3523_v13 = vld [vmem:[%s4079_s11 + $0x54] sm:$0xf0]  ;;  %v4213_v0 = vld [vmem:[%s5087_s3] ss:$0 sm:$0xff]  ;;  %v2995_v28 = vor.u32 %v3530_v18, %v2992_v19 }
  0x5b   : > { %v2959_v20 = vor.u32 %v3523_v13, %v2958_v12  ;;  %v2990_v12 = vld [vmem:[%s4079_s11 + $0x90] sm:$0xf]  ;;  %v3531_v13 = vld [vmem:[%s4079_s11 + $0x94] sm:$0xf0] }
  0x5d   : > { %1196 = vmatpush.bf16.msra.mxu0 %v3640_v14  ;;  %3666 = vmatpush.bf16.msra.mxu2 %v3640_v14  ;;  %v3214_v14 = vld [vmem:[%s4079_s11 + $0x250] sm:$0xf] }
  0x5e   : > { %1525 = vmatpush.bf16.msra.mxu1 %v3648_v15  ;;  %3674 = vmatpush.bf16.msra.mxu3 %v3648_v15  ;;  %v3587_v15 = vld [vmem:[%s4079_s11 + $0x254] sm:$0xf0] }
  0x5f   : > { %v3215_v21 = vor.u32 %v3587_v15, %v3214_v14  ;;  %v3246_v14 = vld [vmem:[%s4079_s11 + $0x290] sm:$0xf]  ;;  %v3595_v15 = vld [vmem:[%s4079_s11 + $0x294] sm:$0xf0] }
  0x60   : > { %1197 = vmatmul.bf16.vlgmr.msra.gmra.mxu0 %v2919_v24  ;;  %1357 = vmatmul.bf16.vlgmr.msra.gmra.mxu2 %v3175_v25  ;;  %v2966_v24 = vld [vmem:[%s4079_s11 + $0x60] sm:$0xf]  ;;  %v3525_v25 = vld [vmem:[%s4079_s11 + $0x64] sm:$0xf0] }
  0x61   : > { %1526 = vmatmul.bf16.vlgmr.msra.gmra.mxu1 %v2923_v26  ;;  %1686 = vmatmul.bf16.vlgmr.msra.gmra.mxu3 %v3179_v27  ;;  %v3222_v26 = vld [vmem:[%s4079_s11 + $0x260] sm:$0xf]  ;;  %v3589_v27 = vld [vmem:[%s4079_s11 + $0x264] sm:$0xf0]  ;;  %v2967_v32 = vor.u32 %v3525_v25, %v2966_v24 }
  0x62   : > { %v3223_v33 = vor.u32 %v3589_v27, %v3222_v26  ;;  %v2991_v26 = vor.u32 %v3531_v13, %v2990_v12  ;;  %v3247_v27 = vor.u32 %v3595_v15, %v3246_v14 }
  0x70   : > { %1202 = vmatmul.bf16.gmra.mxu0 %v2927_v36  ;;  %1362 = vmatmul.bf16.gmra.mxu2 %v3183_v37  ;;  %v2974_v36 = vld [vmem:[%s4079_s11 + $0x70] sm:$0xf]  ;;  %v3527_v37 = vld [vmem:[%s4079_s11 + $0x74] sm:$0xf0] }
  0x71   : > { %1531 = vmatmul.bf16.gmra.mxu1 %v2931_v38  ;;  %1691 = vmatmul.bf16.gmra.mxu3 %v3187_v39  ;;  %v3230_v38 = vld [vmem:[%s4079_s11 + $0x270] sm:$0xf]  ;;  %v3591_v39 = vld [vmem:[%s4079_s11 + $0x274] sm:$0xf0]  ;;  %v2975_v44 = vor.u32 %v3527_v37, %v2974_v36 }
  0x72   : > { %v3231_v45 = vor.u32 %v3591_v39, %v3230_v38 }
  0x80   : > { %1207 = vmatmul.bf16.gmra.mxu0 %v2935_v48  ;;  %1367 = vmatmul.bf16.gmra.mxu2 %v3191_v49  ;;  %v2982_v48 = vld [vmem:[%s4079_s11 + $0x80] sm:$0xf]  ;;  %v3529_v49 = vld [vmem:[%s4079_s11 + $0x84] sm:$0xf0] }
  0x81   : > { %1536 = vmatmul.bf16.gmra.mxu1 %v2939_v50  ;;  %1696 = vmatmul.bf16.gmra.mxu3 %v3195_v51  ;;  %v3238_v50 = vld [vmem:[%s4079_s11 + $0x280] sm:$0xf]  ;;  %v3593_v51 = vld [vmem:[%s4079_s11 + $0x284] sm:$0xf0]  ;;  %v2983_v56 = vor.u32 %v3529_v49, %v2982_v48 }
  0x82   : > { %v3239_v57 = vor.u32 %v3593_v51, %v3238_v50 }
  0x90   : > { %1212 = vmatmul.bf16.gmra.mxu0 %v2943_v60  ;;  %1372 = vmatmul.bf16.gmra.mxu2 %v3199_v61  ;;  %v2987_v60 = vor.u32 %v3528_v52, %v2984_v53  ;;  %v3243_v61 = vor.u32 %v3592_v54, %v3240_v55  ;;  %v2998_v52 = vld [vmem:[%s4079_s11 + $0xa0] sm:$0xf]  ;;  %v3533_v53 = vld [vmem:[%s4079_s11 + $0xa4] sm:$0xf0] }
  0x91   : > { %1541 = vmatmul.bf16.gmra.mxu1 %v2947_v62  ;;  %1701 = vmatmul.bf16.gmra.mxu3 %v3203_v63  ;;  %v3254_v54 = vld [vmem:[%s4079_s11 + $0x2a0] sm:$0xf]  ;;  %v3597_v55 = vld [vmem:[%s4079_s11 + $0x2a4] sm:$0xf0] }
  0xa0   : > { %1217 = vmatmul.bf16.gmra.mxu0 %v2951_v8  ;;  %1377 = vmatmul.bf16.gmra.mxu2 %v3207_v9 }
  0xa1   : > { %1546 = vmatmul.bf16.gmra.mxu1 %v2955_v10  ;;  %1706 = vmatmul.bf16.gmra.mxu3 %v3211_v11 }
  0xb0   : > { %1222 = vmatmul.bf16.gmra.mxu0 %v2959_v20  ;;  %1382 = vmatmul.bf16.gmra.mxu2 %v3215_v21  ;;  %v3594_v20 = vld [vmem:[%s4079_s11 + $0x294] sm:$0xf]  ;;  %v3248_v21 = vld [vmem:[%s4079_s11 + $0x298] sm:$0xf0] }
  0xb1   : > { %1551 = vmatmul.bf16.gmra.mxu1 %v2963_v22  ;;  %1711 = vmatmul.bf16.gmra.mxu3 %v3219_v23 }
  0xc0   : > { %1227 = vmatmul.bf16.gmra.mxu0 %v2967_v32  ;;  %1387 = vmatmul.bf16.gmra.mxu2 %v3223_v33  ;;  %v3251_v33 = vor.u32 %v3594_v20, %v3248_v21 }
  0xc1   : > { %1556 = vmatmul.bf16.gmra.mxu1 %v2971_v34  ;;  %1716 = vmatmul.bf16.gmra.mxu3 %v3227_v35 }
  0xd0   : > { %1232 = vmatmul.bf16.gmra.mxu0 %v2975_v44  ;;  %1392 = vmatmul.bf16.gmra.mxu2 %v3231_v45 }
  0xd1   : > { %1561 = vmatmul.bf16.gmra.mxu1 %v2979_v46  ;;  %1721 = vmatmul.bf16.gmra.mxu3 %v3235_v47 }
  0xdd   : > { %v1198_v58 = vpop.f32.mrf.mxu0 }
  0xde   : > { %v1527_v62 = vpop.f32.mrf.mxu1 }
  0xdf   : > { %v1528_v63 = vadd.f32 %v1527_v62, %v1198_v58  ;;  %v3532_v58 = vld [vmem:[%s4079_s11 + $0xa4] sm:$0xf]  ;;  %v3256_v62 = vld [vmem:[%s4079_s11 + $0x2a8] sm:$0xf0] }
  0xe0   : > { %1237 = vmatmul.bf16.gmra.mxu0 %v2983_v56  ;;  %1397 = vmatmul.bf16.gmra.mxu2 %v3239_v57 }
  0xe1   : > { %v1851_v1 = vmul.f32 %v4208_v59, %v1528_v63  ;;  %1566 = vmatmul.bf16.gmra.mxu1 %v2987_v60  ;;  %1726 = vmatmul.bf16.gmra.mxu3 %v3243_v61  ;;  %v3000_v60 = vld [vmem:[%s4079_s11 + $0xa8] sm:$0xf0]  ;;  %v3596_v61 = vld [vmem:[%s4079_s11 + $0x2a4] sm:$0xf] }
  0xe3   : > { %v1983_v2 = vadd.f32 %v4213_v0, %v1851_v1  ;;  %v1358_v3 = vpop.f32.mrf.mxu2 }
  0xe4   : > { %v1687_v4 = vpop.f32.mrf.mxu3 }
  0xe5   : > { %v2111_v5 = vmax.f32 %v1983_v2, 0.0  ;;  %v1688_v6 = vadd.f32 %v1687_v4, %v1358_v3  ;;  %v1200_v7 = vpop.f32.mrf.mxu0  ;;  %v2999_v4 = vor.u32 %v3533_v53, %v2998_v52 }
  0xe6   : > { %v1529_v8 = vpop.f32.mrf.mxu1 }
  0xe7   : > { %v2239_v9 = vpack.c.bf16 %v2111_v5, %v2111_v5  ;;  %v1915_v10 = vmul.f32 %v4208_v59, %v1688_v6  ;;  %v1530_v11 = vadd.f32 %v1529_v8, %v1200_v7  ;;  %v3255_v5 = vor.u32 %v3597_v55, %v3254_v54 }
  0xe8   : > { %v3003_v6 = vor.u32 %v3532_v58, %v3000_v60 }
  0xe9   : > { %2368 = vst.msk [vmem:[%s4223_s29] sm:$0xf] %vm2367_vm0, %v2239_v9  ;;  %v2047_v16 = vadd.f32 %v4213_v0, %v1915_v10  ;;  %v1852_v17 = vmul.f32 %v4208_v59, %v1530_v11  ;;  %v3259_v11 = vor.u32 %v3596_v61, %v3256_v62 }
  0xeb   : > { %v2175_v22 = vmax.f32 %v2047_v16, 0.0  ;;  %v1984_v23 = vadd.f32 %v4213_v0, %v1852_v17  ;;  %v1360_v24 = vpop.f32.mrf.mxu2 }
  0xec   : > { %v1689_v25 = vpop.f32.mrf.mxu3 }
  0xed   : > { %v2303_v29 = vpack.c.bf16 %v2175_v22, %v2175_v22  ;;  %v2112_v30 = vmax.f32 %v1984_v23, 0.0  ;;  %v1690_v31 = vadd.f32 %v1689_v25, %v1360_v24  ;;  %v1203_v32 = vpop.f32.mrf.mxu0 }
  0xee   : > { %v1532_v34 = vpop.f32.mrf.mxu1 }
  0xef   : > { %2432 = vst.msk [vmem:[%s4223_s29 + $0x100] sm:$0xf] %vm2367_vm0, %v2303_v29  ;;  %v2240_v35 = vpack.c.bf16 %v2112_v30, %v2112_v30  ;;  %v1916_v36 = vmul.f32 %v4208_v59, %v1690_v31  ;;  %v1533_v37 = vadd.f32 %v1532_v34, %v1203_v32  ;;  %v3006_v30 = vld [vmem:[%s4079_s11 + $0xb0] sm:$0xf]  ;;  %v3535_v31 = vld [vmem:[%s4079_s11 + $0xb4] sm:$0xf0] }
  0xf0   : > { %1242 = vmatmul.bf16.gmra.mxu0 %v2991_v26  ;;  %1402 = vmatmul.bf16.gmra.mxu2 %v3247_v27  ;;  %v3262_v32 = vld [vmem:[%s4079_s11 + $0x2b0] sm:$0xf] }
  0xf1   : > { %2369 = vst.msk [vmem:[%s4223_s29 + $0x4] sm:$0xf] %vm2367_vm0, %v2240_v35  ;;  %v2048_v38 = vadd.f32 %v4213_v0, %v1916_v36  ;;  %v1853_v39 = vmul.f32 %v4208_v59, %v1533_v37  ;;  %1571 = vmatmul.bf16.gmra.mxu1 %v2995_v28  ;;  %1731 = vmatmul.bf16.gmra.mxu3 %v3251_v33  ;;  %v3599_v33 = vld [vmem:[%s4079_s11 + $0x2b4] sm:$0xf0]  ;;  %v3534_v36 = vld [vmem:[%s4079_s11 + $0xb4] sm:$0xf] }
  0xf2   : > { %v3008_v37 = vld [vmem:[%s4079_s11 + $0xb8] sm:$0xf0] }
  0xf3   : > { %v2176_v40 = vmax.f32 %v2048_v38, 0.0  ;;  %v1985_v41 = vadd.f32 %v4213_v0, %v1853_v39  ;;  %v1363_v42 = vpop.f32.mrf.mxu2  ;;  %v3598_v38 = vld [vmem:[%s4079_s11 + $0x2b4] sm:$0xf]  ;;  %v3264_v39 = vld [vmem:[%s4079_s11 + $0x2b8] sm:$0xf0] }
  0xf4   : > { %v1692_v43 = vpop.f32.mrf.mxu3 }
  0xf5   : > { %v2304_v44 = vpack.c.bf16 %v2176_v40, %v2176_v40  ;;  %v2113_v45 = vmax.f32 %v1985_v41, 0.0  ;;  %v1693_v46 = vadd.f32 %v1692_v43, %v1363_v42  ;;  %v1205_v47 = vpop.f32.mrf.mxu0 }
  0xf6   : > { %v1534_v48 = vpop.f32.mrf.mxu1 }
  0xf7   : > { %2433 = vst.msk [vmem:[%s4223_s29 + $0x104] sm:$0xf] %vm2367_vm0, %v2304_v44  ;;  %v2241_v49 = vpack.c.bf16 %v2113_v45, %v2113_v45  ;;  %v1917_v50 = vmul.f32 %v4208_v59, %v1693_v46  ;;  %v1535_v51 = vadd.f32 %v1534_v48, %v1205_v47  ;;  %v3007_v44 = vor.u32 %v3535_v31, %v3006_v30 }
  0xf8   : > { %v3263_v45 = vor.u32 %v3599_v33, %v3262_v32  ;;  %v3011_v46 = vor.u32 %v3534_v36, %v3008_v37 }
  0xf9   : > { %2370 = vst.msk [vmem:[%s4223_s29 + $0x8] sm:$0xf] %vm2367_vm0, %v2241_v49  ;;  %v2049_v56 = vadd.f32 %v4213_v0, %v1917_v50  ;;  %v1854_v57 = vmul.f32 %v4208_v59, %v1535_v51  ;;  %v3267_v51 = vor.u32 %v3598_v38, %v3264_v39 }
  0xfb   : > { %v2177_v63 = vmax.f32 %v2049_v56, 0.0  ;;  %v1986_v1 = vadd.f32 %v4213_v0, %v1854_v57  ;;  %v1365_v2 = vpop.f32.mrf.mxu2 }
  0xfc   : > { %v1694_v3 = vpop.f32.mrf.mxu3 }
  0xfd   : > { %v2305_v7 = vpack.c.bf16 %v2177_v63, %v2177_v63  ;;  %v2114_v8 = vmax.f32 %v1986_v1, 0.0  ;;  %v1695_v9 = vadd.f32 %v1694_v3, %v1365_v2  ;;  %v1208_v10 = vpop.f32.mrf.mxu0 }
  0xfe   : > { %v1537_v12 = vpop.f32.mrf.mxu1 }
  0xff   : > { %2434 = vst.msk [vmem:[%s4223_s29 + $0x108] sm:$0xf] %vm2367_vm0, %v2305_v7  ;;  %v2242_v13 = vpack.c.bf16 %v2114_v8, %v2114_v8  ;;  %v1918_v14 = vmul.f32 %v4208_v59, %v1695_v9  ;;  %v1538_v15 = vadd.f32 %v1537_v12, %v1208_v10  ;;  %v3014_v8 = vld [vmem:[%s4079_s11 + $0xc0] sm:$0xf]  ;;  %v3537_v9 = vld [vmem:[%s4079_s11 + $0xc4] sm:$0xf0] }
 0x100   : > { %1247 = vmatmul.bf16.gmra.mxu0 %v2999_v4  ;;  %1407 = vmatmul.bf16.gmra.mxu2 %v3255_v5  ;;  %v3270_v10 = vld [vmem:[%s4079_s11 + $0x2c0] sm:$0xf] }
 0x101   : > { %2371 = vst.msk [vmem:[%s4223_s29 + $0xc] sm:$0xf] %vm2367_vm0, %v2242_v13  ;;  %v2050_v16 = vadd.f32 %v4213_v0, %v1918_v14  ;;  %v1855_v17 = vmul.f32 %v4208_v59, %v1538_v15  ;;  %1576 = vmatmul.bf16.gmra.mxu1 %v3003_v6  ;;  %1736 = vmatmul.bf16.gmra.mxu3 %v3259_v11  ;;  %v3601_v11 = vld [vmem:[%s4079_s11 + $0x2c4] sm:$0xf0]  ;;  %v3536_v14 = vld [vmem:[%s4079_s11 + $0xc4] sm:$0xf] }
 0x102   : > { %v3016_v15 = vld [vmem:[%s4079_s11 + $0xc8] sm:$0xf0] }
 0x103   : > { %v2178_v18 = vmax.f32 %v2050_v16, 0.0  ;;  %v1987_v19 = vadd.f32 %v4213_v0, %v1855_v17  ;;  %v1368_v20 = vpop.f32.mrf.mxu2  ;;  %v3600_v16 = vld [vmem:[%s4079_s11 + $0x2c4] sm:$0xf]  ;;  %v3272_v17 = vld [vmem:[%s4079_s11 + $0x2c8] sm:$0xf0] }
 0x104   : > { %v1697_v21 = vpop.f32.mrf.mxu3 }
 0x105   : > { %v2306_v22 = vpack.c.bf16 %v2178_v18, %v2178_v18  ;;  %v2115_v23 = vmax.f32 %v1987_v19, 0.0  ;;  %v1698_v24 = vadd.f32 %v1697_v21, %v1368_v20  ;;  %v1210_v25 = vpop.f32.mrf.mxu0 }
 0x106   : > { %v1539_v26 = vpop.f32.mrf.mxu1 }
 0x107   : > { %2435 = vst.msk [vmem:[%s4223_s29 + $0x10c] sm:$0xf] %vm2367_vm0, %v2306_v22  ;;  %v2243_v27 = vpack.c.bf16 %v2115_v23, %v2115_v23  ;;  %v1919_v28 = vmul.f32 %v4208_v59, %v1698_v24  ;;  %v1540_v29 = vadd.f32 %v1539_v26, %v1210_v25  ;;  %v3015_v22 = vor.u32 %v3537_v9, %v3014_v8 }
 0x108   : > { %v3271_v23 = vor.u32 %v3601_v11, %v3270_v10  ;;  %v3019_v24 = vor.u32 %v3536_v14, %v3016_v15 }
 0x109   : > { %2372 = vst.msk [vmem:[%s4223_s29 + $0x10] sm:$0xf] %vm2367_vm0, %v2243_v27  ;;  %v2051_v34 = vadd.f32 %v4213_v0, %v1919_v28  ;;  %v1856_v35 = vmul.f32 %v4208_v59, %v1540_v29  ;;  %v3275_v29 = vor.u32 %v3600_v16, %v3272_v17 }
 0x10b   : > { %v2179_v40 = vmax.f32 %v2051_v34, 0.0  ;;  %v1988_v41 = vadd.f32 %v4213_v0, %v1856_v35  ;;  %v1370_v42 = vpop.f32.mrf.mxu2 }
 0x10c   : > { %v1699_v43 = vpop.f32.mrf.mxu3 }
 0x10d   : > { %v2307_v47 = vpack.c.bf16 %v2179_v40, %v2179_v40  ;;  %v2116_v48 = vmax.f32 %v1988_v41, 0.0  ;;  %v1700_v49 = vadd.f32 %v1699_v43, %v1370_v42  ;;  %v1213_v50 = vpop.f32.mrf.mxu0 }
 0x10e   : > { %v1542_v52 = vpop.f32.mrf.mxu1 }
 0x10f   : > { %2436 = vst.msk [vmem:[%s4223_s29 + $0x110] sm:$0xf] %vm2367_vm0, %v2307_v47  ;;  %v2244_v53 = vpack.c.bf16 %v2116_v48, %v2116_v48  ;;  %v1920_v54 = vmul.f32 %v4208_v59, %v1700_v49  ;;  %v1543_v55 = vadd.f32 %v1542_v52, %v1213_v50  ;;  %v3022_v48 = vld [vmem:[%s4079_s11 + $0xd0] sm:$0xf]  ;;  %v3539_v49 = vld [vmem:[%s4079_s11 + $0xd4] sm:$0xf0] }
 0x110   : > { %1252 = vmatmul.bf16.gmra.mxu0 %v3007_v44  ;;  %1412 = vmatmul.bf16.gmra.mxu2 %v3263_v45  ;;  %v3278_v50 = vld [vmem:[%s4079_s11 + $0x2d0] sm:$0xf] }
 0x111   : > { %2373 = vst.msk [vmem:[%s4223_s29 + $0x14] sm:$0xf] %vm2367_vm0, %v2244_v53  ;;  %v2052_v56 = vadd.f32 %v4213_v0, %v1920_v54  ;;  %v1857_v57 = vmul.f32 %v4208_v59, %v1543_v55  ;;  %1581 = vmatmul.bf16.gmra.mxu1 %v3011_v46  ;;  %1741 = vmatmul.bf16.gmra.mxu3 %v3267_v51  ;;  %v3603_v51 = vld [vmem:[%s4079_s11 + $0x2d4] sm:$0xf0]  ;;  %v3538_v54 = vld [vmem:[%s4079_s11 + $0xd4] sm:$0xf] }
 0x112   : > { %v3024_v55 = vld [vmem:[%s4079_s11 + $0xd8] sm:$0xf0] }
 0x113   : > { %v2180_v58 = vmax.f32 %v2052_v56, 0.0  ;;  %v1989_v60 = vadd.f32 %v4213_v0, %v1857_v57  ;;  %v1373_v61 = vpop.f32.mrf.mxu2  ;;  %v3602_v56 = vld [vmem:[%s4079_s11 + $0x2d4] sm:$0xf]  ;;  %v3280_v57 = vld [vmem:[%s4079_s11 + $0x2d8] sm:$0xf0] }
 0x114   : > { %v1702_v62 = vpop.f32.mrf.mxu3 }
 0x115   : > { %v2308_v63 = vpack.c.bf16 %v2180_v58, %v2180_v58  ;;  %v2117_v1 = vmax.f32 %v1989_v60, 0.0  ;;  %v1703_v2 = vadd.f32 %v1702_v62, %v1373_v61  ;;  %v1215_v3 = vpop.f32.mrf.mxu0 }
 0x116   : > { %v1544_v4 = vpop.f32.mrf.mxu1 }
 0x117   : > { %2437 = vst.msk [vmem:[%s4223_s29 + $0x114] sm:$0xf] %vm2367_vm0, %v2308_v63  ;;  %v2245_v5 = vpack.c.bf16 %v2117_v1, %v2117_v1  ;;  %v1921_v6 = vmul.f32 %v4208_v59, %v1703_v2  ;;  %v1545_v7 = vadd.f32 %v1544_v4, %v1215_v3  ;;  %v3023_v63 = vor.u32 %v3539_v49, %v3022_v48 }
 0x118   : > { %v3279_v1 = vor.u32 %v3603_v51, %v3278_v50  ;;  %v3027_v2 = vor.u32 %v3538_v54, %v3024_v55 }
 0x119   : > { %2374 = vst.msk [vmem:[%s4223_s29 + $0x18] sm:$0xf] %vm2367_vm0, %v2245_v5  ;;  %v2053_v12 = vadd.f32 %v4213_v0, %v1921_v6  ;;  %v1858_v13 = vmul.f32 %v4208_v59, %v1545_v7  ;;  %v3283_v7 = vor.u32 %v3602_v56, %v3280_v57 }
 0x11b   : > { %v2181_v18 = vmax.f32 %v2053_v12, 0.0  ;;  %v1990_v19 = vadd.f32 %v4213_v0, %v1858_v13  ;;  %v1375_v20 = vpop.f32.mrf.mxu2 }
 0x11c   : > { %v1704_v21 = vpop.f32.mrf.mxu3 }
 0x11d   : > { %v2309_v25 = vpack.c.bf16 %v2181_v18, %v2181_v18  ;;  %v2118_v26 = vmax.f32 %v1990_v19, 0.0  ;;  %v1705_v27 = vadd.f32 %v1704_v21, %v1375_v20  ;;  %v1218_v28 = vpop.f32.mrf.mxu0 }
 0x11e   : > { %v1547_v30 = vpop.f32.mrf.mxu1 }
 0x11f   : > { %2438 = vst.msk [vmem:[%s4223_s29 + $0x118] sm:$0xf] %vm2367_vm0, %v2309_v25  ;;  %v2246_v31 = vpack.c.bf16 %v2118_v26, %v2118_v26  ;;  %v1922_v32 = vmul.f32 %v4208_v59, %v1705_v27  ;;  %v1548_v33 = vadd.f32 %v1547_v30, %v1218_v28  ;;  %v3030_v26 = vld [vmem:[%s4079_s11 + $0xe0] sm:$0xf]  ;;  %v3541_v27 = vld [vmem:[%s4079_s11 + $0xe4] sm:$0xf0] }
 0x120   : > { %1257 = vmatmul.bf16.gmra.mxu0 %v3015_v22  ;;  %1417 = vmatmul.bf16.gmra.mxu2 %v3271_v23  ;;  %v3286_v28 = vld [vmem:[%s4079_s11 + $0x2e0] sm:$0xf] }
 0x121   : > { %2375 = vst.msk [vmem:[%s4223_s29 + $0x1c] sm:$0xf] %vm2367_vm0, %v2246_v31  ;;  %v2054_v34 = vadd.f32 %v4213_v0, %v1922_v32  ;;  %v1859_v35 = vmul.f32 %v4208_v59, %v1548_v33  ;;  %1586 = vmatmul.bf16.gmra.mxu1 %v3019_v24  ;;  %1746 = vmatmul.bf16.gmra.mxu3 %v3275_v29  ;;  %v3605_v29 = vld [vmem:[%s4079_s11 + $0x2e4] sm:$0xf0]  ;;  %v3540_v32 = vld [vmem:[%s4079_s11 + $0xe4] sm:$0xf] }
 0x122   : > { %v3032_v33 = vld [vmem:[%s4079_s11 + $0xe8] sm:$0xf0] }
 0x123   : > { %v2182_v36 = vmax.f32 %v2054_v34, 0.0  ;;  %v1991_v37 = vadd.f32 %v4213_v0, %v1859_v35  ;;  %v1378_v38 = vpop.f32.mrf.mxu2  ;;  %v3604_v34 = vld [vmem:[%s4079_s11 + $0x2e4] sm:$0xf]  ;;  %v3288_v35 = vld [vmem:[%s4079_s11 + $0x2e8] sm:$0xf0] }
 0x124   : > { %v1707_v39 = vpop.f32.mrf.mxu3 }
 0x125   : > { %v2310_v40 = vpack.c.bf16 %v2182_v36, %v2182_v36  ;;  %v2119_v41 = vmax.f32 %v1991_v37, 0.0  ;;  %v1708_v42 = vadd.f32 %v1707_v39, %v1378_v38  ;;  %v1220_v43 = vpop.f32.mrf.mxu0 }
 0x126   : > { %v1549_v44 = vpop.f32.mrf.mxu1 }
 0x127   : > { %2439 = vst.msk [vmem:[%s4223_s29 + $0x11c] sm:$0xf] %vm2367_vm0, %v2310_v40  ;;  %v2247_v45 = vpack.c.bf16 %v2119_v41, %v2119_v41  ;;  %v1923_v46 = vmul.f32 %v4208_v59, %v1708_v42  ;;  %v1550_v47 = vadd.f32 %v1549_v44, %v1220_v43  ;;  %v3031_v40 = vor.u32 %v3541_v27, %v3030_v26 }
 0x128   : > { %v3287_v41 = vor.u32 %v3605_v29, %v3286_v28  ;;  %v3035_v42 = vor.u32 %v3540_v32, %v3032_v33 }
 0x129   : > { %2376 = vst.msk [vmem:[%s4223_s29 + $0x20] sm:$0xf] %vm2367_vm0, %v2247_v45  ;;  %v2055_v52 = vadd.f32 %v4213_v0, %v1923_v46  ;;  %v1860_v53 = vmul.f32 %v4208_v59, %v1550_v47  ;;  %v3291_v47 = vor.u32 %v3604_v34, %v3288_v35 }
 0x12b   : > { %v2183_v58 = vmax.f32 %v2055_v52, 0.0  ;;  %v1992_v60 = vadd.f32 %v4213_v0, %v1860_v53  ;;  %v1380_v61 = vpop.f32.mrf.mxu2 }
 0x12c   : > { %v1709_v62 = vpop.f32.mrf.mxu3 }
 0x12d   : > { %v2311_v3 = vpack.c.bf16 %v2183_v58, %v2183_v58  ;;  %v2120_v4 = vmax.f32 %v1992_v60, 0.0  ;;  %v1710_v5 = vadd.f32 %v1709_v62, %v1380_v61  ;;  %v1223_v6 = vpop.f32.mrf.mxu0 }
 0x12e   : > { %v1552_v8 = vpop.f32.mrf.mxu1 }
 0x12f   : > { %2440 = vst.msk [vmem:[%s4223_s29 + $0x120] sm:$0xf] %vm2367_vm0, %v2311_v3  ;;  %v2248_v9 = vpack.c.bf16 %v2120_v4, %v2120_v4  ;;  %v1924_v10 = vmul.f32 %v4208_v59, %v1710_v5  ;;  %v1553_v11 = vadd.f32 %v1552_v8, %v1223_v6  ;;  %v3038_v4 = vld [vmem:[%s4079_s11 + $0xf0] sm:$0xf]  ;;  %v3543_v5 = vld [vmem:[%s4079_s11 + $0xf4] sm:$0xf0] }
 0x130   : > { %1262 = vmatmul.bf16.gmra.mxu0 %v3023_v63  ;;  %1422 = vmatmul.bf16.gmra.mxu2 %v3279_v1  ;;  %v3294_v6 = vld [vmem:[%s4079_s11 + $0x2f0] sm:$0xf] }
 0x131   : > { %2377 = vst.msk [vmem:[%s4223_s29 + $0x24] sm:$0xf] %vm2367_vm0, %v2248_v9  ;;  %v2056_v12 = vadd.f32 %v4213_v0, %v1924_v10  ;;  %v1861_v13 = vmul.f32 %v4208_v59, %v1553_v11  ;;  %1591 = vmatmul.bf16.gmra.mxu1 %v3027_v2  ;;  %1751 = vmatmul.bf16.gmra.mxu3 %v3283_v7  ;;  %v3607_v7 = vld [vmem:[%s4079_s11 + $0x2f4] sm:$0xf0]  ;;  %v3542_v10 = vld [vmem:[%s4079_s11 + $0xf4] sm:$0xf] }
 0x132   : > { %v3040_v11 = vld [vmem:[%s4079_s11 + $0xf8] sm:$0xf0] }
 0x133   : > { %v2184_v14 = vmax.f32 %v2056_v12, 0.0  ;;  %v1993_v15 = vadd.f32 %v4213_v0, %v1861_v13  ;;  %v1383_v16 = vpop.f32.mrf.mxu2  ;;  %v3606_v12 = vld [vmem:[%s4079_s11 + $0x2f4] sm:$0xf]  ;;  %v3296_v13 = vld [vmem:[%s4079_s11 + $0x2f8] sm:$0xf0] }
 0x134   : > { %v1712_v17 = vpop.f32.mrf.mxu3 }
 0x135   : > { %v2312_v18 = vpack.c.bf16 %v2184_v14, %v2184_v14  ;;  %v2121_v19 = vmax.f32 %v1993_v15, 0.0  ;;  %v1713_v20 = vadd.f32 %v1712_v17, %v1383_v16  ;;  %v1225_v21 = vpop.f32.mrf.mxu0 }
 0x136   : > { %v1554_v22 = vpop.f32.mrf.mxu1 }
 0x137   : > { %2441 = vst.msk [vmem:[%s4223_s29 + $0x124] sm:$0xf] %vm2367_vm0, %v2312_v18  ;;  %v2249_v23 = vpack.c.bf16 %v2121_v19, %v2121_v19  ;;  %v1925_v24 = vmul.f32 %v4208_v59, %v1713_v20  ;;  %v1555_v25 = vadd.f32 %v1554_v22, %v1225_v21  ;;  %v3039_v18 = vor.u32 %v3543_v5, %v3038_v4 }
 0x138   : > { %v3295_v19 = vor.u32 %v3607_v7, %v3294_v6  ;;  %v3043_v20 = vor.u32 %v3542_v10, %v3040_v11 }
 0x139   : > { %2378 = vst.msk [vmem:[%s4223_s29 + $0x28] sm:$0xf] %vm2367_vm0, %v2249_v23  ;;  %v2057_v30 = vadd.f32 %v4213_v0, %v1925_v24  ;;  %v1862_v31 = vmul.f32 %v4208_v59, %v1555_v25  ;;  %v3299_v25 = vor.u32 %v3606_v12, %v3296_v13 }
 0x13b   : > { %v2185_v36 = vmax.f32 %v2057_v30, 0.0  ;;  %v1994_v37 = vadd.f32 %v4213_v0, %v1862_v31  ;;  %v1385_v38 = vpop.f32.mrf.mxu2 }
 0x13c   : > { %v1714_v39 = vpop.f32.mrf.mxu3 }
 0x13d   : > { %v2313_v43 = vpack.c.bf16 %v2185_v36, %v2185_v36  ;;  %v2122_v44 = vmax.f32 %v1994_v37, 0.0  ;;  %v1715_v45 = vadd.f32 %v1714_v39, %v1385_v38  ;;  %v1228_v46 = vpop.f32.mrf.mxu0 }
 0x13e   : > { %v1557_v48 = vpop.f32.mrf.mxu1 }
 0x13f   : > { %2442 = vst.msk [vmem:[%s4223_s29 + $0x128] sm:$0xf] %vm2367_vm0, %v2313_v43  ;;  %v2250_v49 = vpack.c.bf16 %v2122_v44, %v2122_v44  ;;  %v1926_v50 = vmul.f32 %v4208_v59, %v1715_v45  ;;  %v1558_v51 = vadd.f32 %v1557_v48, %v1228_v46  ;;  %v3046_v44 = vld [vmem:[%s4079_s11 + $0x100] sm:$0xf]  ;;  %v3545_v45 = vld [vmem:[%s4079_s11 + $0x104] sm:$0xf0] }
 0x140   : > { %1267 = vmatmul.bf16.gmra.mxu0 %v3031_v40  ;;  %1427 = vmatmul.bf16.gmra.mxu2 %v3287_v41  ;;  %v3302_v46 = vld [vmem:[%s4079_s11 + $0x300] sm:$0xf] }
 0x141   : > { %2379 = vst.msk [vmem:[%s4223_s29 + $0x2c] sm:$0xf] %vm2367_vm0, %v2250_v49  ;;  %v2058_v52 = vadd.f32 %v4213_v0, %v1926_v50  ;;  %v1863_v53 = vmul.f32 %v4208_v59, %v1558_v51  ;;  %1596 = vmatmul.bf16.gmra.mxu1 %v3035_v42  ;;  %1756 = vmatmul.bf16.gmra.mxu3 %v3291_v47  ;;  %v3609_v47 = vld [vmem:[%s4079_s11 + $0x304] sm:$0xf0]  ;;  %v3544_v50 = vld [vmem:[%s4079_s11 + $0x104] sm:$0xf] }
 0x142   : > { %v3048_v51 = vld [vmem:[%s4079_s11 + $0x108] sm:$0xf0] }
 0x143   : > { %v2186_v54 = vmax.f32 %v2058_v52, 0.0  ;;  %v1995_v55 = vadd.f32 %v4213_v0, %v1863_v53  ;;  %v1388_v56 = vpop.f32.mrf.mxu2  ;;  %v3608_v52 = vld [vmem:[%s4079_s11 + $0x304] sm:$0xf]  ;;  %v3304_v53 = vld [vmem:[%s4079_s11 + $0x308] sm:$0xf0] }
 0x144   : > { %v1717_v57 = vpop.f32.mrf.mxu3 }
 0x145   : > { %v2314_v58 = vpack.c.bf16 %v2186_v54, %v2186_v54  ;;  %v2123_v60 = vmax.f32 %v1995_v55, 0.0  ;;  %v1718_v61 = vadd.f32 %v1717_v57, %v1388_v56  ;;  %v1230_v62 = vpop.f32.mrf.mxu0 }
 0x146   : > { %v1559_v63 = vpop.f32.mrf.mxu1 }
 0x147   : > { %2443 = vst.msk [vmem:[%s4223_s29 + $0x12c] sm:$0xf] %vm2367_vm0, %v2314_v58  ;;  %v2251_v1 = vpack.c.bf16 %v2123_v60, %v2123_v60  ;;  %v1927_v2 = vmul.f32 %v4208_v59, %v1718_v61  ;;  %v1560_v3 = vadd.f32 %v1559_v63, %v1230_v62  ;;  %v3047_v58 = vor.u32 %v3545_v45, %v3046_v44 }
 0x148   : > { %v3303_v60 = vor.u32 %v3609_v47, %v3302_v46  ;;  %v3051_v61 = vor.u32 %v3544_v50, %v3048_v51 }
 0x149   : > { %2380 = vst.msk [vmem:[%s4223_s29 + $0x30] sm:$0xf] %vm2367_vm0, %v2251_v1  ;;  %v2059_v8 = vadd.f32 %v4213_v0, %v1927_v2  ;;  %v1864_v9 = vmul.f32 %v4208_v59, %v1560_v3  ;;  %v3307_v3 = vor.u32 %v3608_v52, %v3304_v53 }
 0x14b   : > { %v2187_v14 = vmax.f32 %v2059_v8, 0.0  ;;  %v1996_v15 = vadd.f32 %v4213_v0, %v1864_v9  ;;  %v1390_v16 = vpop.f32.mrf.mxu2 }
 0x14c   : > { %v1719_v17 = vpop.f32.mrf.mxu3 }
 0x14d   : > { %v2315_v21 = vpack.c.bf16 %v2187_v14, %v2187_v14  ;;  %v2124_v22 = vmax.f32 %v1996_v15, 0.0  ;;  %v1720_v23 = vadd.f32 %v1719_v17, %v1390_v16  ;;  %v1233_v24 = vpop.f32.mrf.mxu0 }
 0x14e   : > { %v1562_v26 = vpop.f32.mrf.mxu1 }
 0x14f   : > { %2444 = vst.msk [vmem:[%s4223_s29 + $0x130] sm:$0xf] %vm2367_vm0, %v2315_v21  ;;  %v2252_v27 = vpack.c.bf16 %v2124_v22, %v2124_v22  ;;  %v1928_v28 = vmul.f32 %v4208_v59, %v1720_v23  ;;  %v1563_v29 = vadd.f32 %v1562_v26, %v1233_v24  ;;  %v3054_v22 = vld [vmem:[%s4079_s11 + $0x110] sm:$0xf]  ;;  %v3547_v23 = vld [vmem:[%s4079_s11 + $0x114] sm:$0xf0] }
 0x150   : > { %1272 = vmatmul.bf16.gmra.mxu0 %v3039_v18  ;;  %1432 = vmatmul.bf16.gmra.mxu2 %v3295_v19  ;;  %v3310_v24 = vld [vmem:[%s4079_s11 + $0x310] sm:$0xf] }
 0x151   : > { %2381 = vst.msk [vmem:[%s4223_s29 + $0x34] sm:$0xf] %vm2367_vm0, %v2252_v27  ;;  %v2060_v30 = vadd.f32 %v4213_v0, %v1928_v28  ;;  %v1865_v31 = vmul.f32 %v4208_v59, %v1563_v29  ;;  %1601 = vmatmul.bf16.gmra.mxu1 %v3043_v20  ;;  %1761 = vmatmul.bf16.gmra.mxu3 %v3299_v25  ;;  %v3611_v25 = vld [vmem:[%s4079_s11 + $0x314] sm:$0xf0]  ;;  %v3546_v28 = vld [vmem:[%s4079_s11 + $0x114] sm:$0xf] }
 0x152   : > { %v3056_v29 = vld [vmem:[%s4079_s11 + $0x118] sm:$0xf0] }
 0x153   : > { %v2188_v32 = vmax.f32 %v2060_v30, 0.0  ;;  %v1997_v33 = vadd.f32 %v4213_v0, %v1865_v31  ;;  %v1393_v34 = vpop.f32.mrf.mxu2  ;;  %v3610_v30 = vld [vmem:[%s4079_s11 + $0x314] sm:$0xf]  ;;  %v3312_v31 = vld [vmem:[%s4079_s11 + $0x318] sm:$0xf0] }
 0x154   : > { %v1722_v35 = vpop.f32.mrf.mxu3 }
 0x155   : > { %v2316_v36 = vpack.c.bf16 %v2188_v32, %v2188_v32  ;;  %v2125_v37 = vmax.f32 %v1997_v33, 0.0  ;;  %v1723_v38 = vadd.f32 %v1722_v35, %v1393_v34  ;;  %v1235_v39 = vpop.f32.mrf.mxu0 }
 0x156   : > { %v1564_v40 = vpop.f32.mrf.mxu1 }
 0x157   : > { %2445 = vst.msk [vmem:[%s4223_s29 + $0x134] sm:$0xf] %vm2367_vm0, %v2316_v36  ;;  %v2253_v41 = vpack.c.bf16 %v2125_v37, %v2125_v37  ;;  %v1929_v42 = vmul.f32 %v4208_v59, %v1723_v38  ;;  %v1565_v43 = vadd.f32 %v1564_v40, %v1235_v39  ;;  %v3055_v36 = vor.u32 %v3547_v23, %v3054_v22 }
 0x158   : > { %v3311_v37 = vor.u32 %v3611_v25, %v3310_v24  ;;  %v3059_v38 = vor.u32 %v3546_v28, %v3056_v29 }
 0x159   : > { %2382 = vst.msk [vmem:[%s4223_s29 + $0x38] sm:$0xf] %vm2367_vm0, %v2253_v41  ;;  %v2061_v48 = vadd.f32 %v4213_v0, %v1929_v42  ;;  %v1866_v49 = vmul.f32 %v4208_v59, %v1565_v43  ;;  %v3315_v43 = vor.u32 %v3610_v30, %v3312_v31 }
 0x15b   : > { %v2189_v54 = vmax.f32 %v2061_v48, 0.0  ;;  %v1998_v55 = vadd.f32 %v4213_v0, %v1866_v49  ;;  %v1395_v56 = vpop.f32.mrf.mxu2 }
 0x15c   : > { %v1724_v57 = vpop.f32.mrf.mxu3 }
 0x15d   : > { %v2317_v62 = vpack.c.bf16 %v2189_v54, %v2189_v54  ;;  %v2126_v63 = vmax.f32 %v1998_v55, 0.0  ;;  %v1725_v1 = vadd.f32 %v1724_v57, %v1395_v56  ;;  %v1238_v2 = vpop.f32.mrf.mxu0 }
 0x15e   : > { %v1567_v4 = vpop.f32.mrf.mxu1 }
 0x15f   : > { %2446 = vst.msk [vmem:[%s4223_s29 + $0x138] sm:$0xf] %vm2367_vm0, %v2317_v62  ;;  %v2254_v5 = vpack.c.bf16 %v2126_v63, %v2126_v63  ;;  %v1930_v6 = vmul.f32 %v4208_v59, %v1725_v1  ;;  %v1568_v7 = vadd.f32 %v1567_v4, %v1238_v2  ;;  %v3062_v63 = vld [vmem:[%s4079_s11 + $0x120] sm:$0xf]  ;;  %v3549_v1 = vld [vmem:[%s4079_s11 + $0x124] sm:$0xf0] }
 0x160   : > { %1277 = vmatmul.bf16.gmra.mxu0 %v3047_v58  ;;  %1437 = vmatmul.bf16.gmra.mxu2 %v3303_v60  ;;  %v3318_v2 = vld [vmem:[%s4079_s11 + $0x320] sm:$0xf] }
 0x161   : > { %2383 = vst.msk [vmem:[%s4223_s29 + $0x3c] sm:$0xf] %vm2367_vm0, %v2254_v5  ;;  %v2062_v8 = vadd.f32 %v4213_v0, %v1930_v6  ;;  %v1867_v9 = vmul.f32 %v4208_v59, %v1568_v7  ;;  %1606 = vmatmul.bf16.gmra.mxu1 %v3051_v61  ;;  %1766 = vmatmul.bf16.gmra.mxu3 %v3307_v3  ;;  %v3613_v3 = vld [vmem:[%s4079_s11 + $0x324] sm:$0xf0]  ;;  %v3548_v6 = vld [vmem:[%s4079_s11 + $0x124] sm:$0xf] }
 0x162   : > { %v3064_v7 = vld [vmem:[%s4079_s11 + $0x128] sm:$0xf0] }
 0x163   : > { %v2190_v10 = vmax.f32 %v2062_v8, 0.0  ;;  %v1999_v11 = vadd.f32 %v4213_v0, %v1867_v9  ;;  %v1398_v12 = vpop.f32.mrf.mxu2  ;;  %v3612_v8 = vld [vmem:[%s4079_s11 + $0x324] sm:$0xf]  ;;  %v3320_v9 = vld [vmem:[%s4079_s11 + $0x328] sm:$0xf0] }
 0x164   : > { %v1727_v13 = vpop.f32.mrf.mxu3 }
 0x165   : > { %v2318_v14 = vpack.c.bf16 %v2190_v10, %v2190_v10  ;;  %v2127_v15 = vmax.f32 %v1999_v11, 0.0  ;;  %v1728_v16 = vadd.f32 %v1727_v13, %v1398_v12  ;;  %v1240_v17 = vpop.f32.mrf.mxu0 }
 0x166   : > { %v1569_v18 = vpop.f32.mrf.mxu1 }
 0x167   : > { %2447 = vst.msk [vmem:[%s4223_s29 + $0x13c] sm:$0xf] %vm2367_vm0, %v2318_v14  ;;  %v2255_v19 = vpack.c.bf16 %v2127_v15, %v2127_v15  ;;  %v1931_v20 = vmul.f32 %v4208_v59, %v1728_v16  ;;  %v1570_v21 = vadd.f32 %v1569_v18, %v1240_v17  ;;  %v3063_v14 = vor.u32 %v3549_v1, %v3062_v63  ;;  %v4479_v1 = vld [vmem:[%s5086_s2] ss:$0 sm:$0xff] }
 0x168   : > { %v3319_v15 = vor.u32 %v3613_v3, %v3318_v2  ;;  %v3067_v16 = vor.u32 %v3548_v6, %v3064_v7  ;;  %v4487_v3 = vld [vmem:[%s5087_s3] ss:$0 sm:$0xff] }
 0x169   : > { %2384 = vst.msk [vmem:[%s4223_s29 + $0x40] sm:$0xf] %vm2367_vm0, %v2255_v19  ;;  %v2063_v26 = vadd.f32 %v4213_v0, %v1931_v20  ;;  %v1868_v27 = vmul.f32 %v4208_v59, %v1570_v21  ;;  %v3323_v21 = vor.u32 %v3612_v8, %v3320_v9 }
 0x16b   : > { %v2191_v32 = vmax.f32 %v2063_v26, 0.0  ;;  %v2000_v33 = vadd.f32 %v4213_v0, %v1868_v27  ;;  %v1400_v34 = vpop.f32.mrf.mxu2 }
 0x16c   : > { %v1729_v35 = vpop.f32.mrf.mxu3 }
 0x16d   : > { %v2319_v39 = vpack.c.bf16 %v2191_v32, %v2191_v32  ;;  %v2128_v40 = vmax.f32 %v2000_v33, 0.0  ;;  %v1730_v41 = vadd.f32 %v1729_v35, %v1400_v34  ;;  %v1243_v42 = vpop.f32.mrf.mxu0 }
 0x16e   : > { %v1572_v44 = vpop.f32.mrf.mxu1 }
 0x16f   : > { %2448 = vst.msk [vmem:[%s4223_s29 + $0x140] sm:$0xf] %vm2367_vm0, %v2319_v39  ;;  %v2256_v45 = vpack.c.bf16 %v2128_v40, %v2128_v40  ;;  %v1932_v46 = vmul.f32 %v4208_v59, %v1730_v41  ;;  %v1573_v47 = vadd.f32 %v1572_v44, %v1243_v42  ;;  %v3070_v40 = vld [vmem:[%s4079_s11 + $0x130] sm:$0xf]  ;;  %v3551_v41 = vld [vmem:[%s4079_s11 + $0x134] sm:$0xf0] }
 0x170   : > { %1282 = vmatmul.bf16.gmra.mxu0 %v3055_v36  ;;  %1442 = vmatmul.bf16.gmra.mxu2 %v3311_v37  ;;  %v3326_v42 = vld [vmem:[%s4079_s11 + $0x330] sm:$0xf] }
 0x171   : > { %2385 = vst.msk [vmem:[%s4223_s29 + $0x44] sm:$0xf] %vm2367_vm0, %v2256_v45  ;;  %v2064_v48 = vadd.f32 %v4213_v0, %v1932_v46  ;;  %v1869_v49 = vmul.f32 %v4208_v59, %v1573_v47  ;;  %1611 = vmatmul.bf16.gmra.mxu1 %v3059_v38  ;;  %1771 = vmatmul.bf16.gmra.mxu3 %v3315_v43  ;;  %v3615_v43 = vld [vmem:[%s4079_s11 + $0x334] sm:$0xf0]  ;;  %v3550_v46 = vld [vmem:[%s4079_s11 + $0x134] sm:$0xf] }
 0x172   : > { %v3072_v47 = vld [vmem:[%s4079_s11 + $0x138] sm:$0xf0] }
 0x173   : > { %v2192_v50 = vmax.f32 %v2064_v48, 0.0  ;;  %v2001_v51 = vadd.f32 %v4213_v0, %v1869_v49  ;;  %v1403_v52 = vpop.f32.mrf.mxu2  ;;  %v3614_v48 = vld [vmem:[%s4079_s11 + $0x334] sm:$0xf]  ;;  %v3328_v49 = vld [vmem:[%s4079_s11 + $0x338] sm:$0xf0] }
 0x174   : > { %v1732_v53 = vpop.f32.mrf.mxu3 }
 0x175   : > { %v2320_v54 = vpack.c.bf16 %v2192_v50, %v2192_v50  ;;  %v2129_v55 = vmax.f32 %v2001_v51, 0.0  ;;  %v1733_v56 = vadd.f32 %v1732_v53, %v1403_v52  ;;  %v1245_v57 = vpop.f32.mrf.mxu0 }
 0x176   : > { %v1574_v58 = vpop.f32.mrf.mxu1 }
 0x177   : > { %2449 = vst.msk [vmem:[%s4223_s29 + $0x144] sm:$0xf] %vm2367_vm0, %v2320_v54  ;;  %v2257_v60 = vpack.c.bf16 %v2129_v55, %v2129_v55  ;;  %v1933_v61 = vmul.f32 %v4208_v59, %v1733_v56  ;;  %v1575_v62 = vadd.f32 %v1574_v58, %v1245_v57  ;;  %v3071_v54 = vor.u32 %v3551_v41, %v3070_v40 }
 0x178   : > { %v3327_v55 = vor.u32 %v3615_v43, %v3326_v42  ;;  %v3075_v56 = vor.u32 %v3550_v46, %v3072_v47 }
 0x179   : > { %2386 = vst.msk [vmem:[%s4223_s29 + $0x48] sm:$0xf] %vm2367_vm0, %v2257_v60  ;;  %v2065_v4 = vadd.f32 %v4213_v0, %v1933_v61  ;;  %v1870_v5 = vmul.f32 %v4208_v59, %v1575_v62  ;;  %v3331_v62 = vor.u32 %v3614_v48, %v3328_v49 }
 0x17b   : > { %v2193_v10 = vmax.f32 %v2065_v4, 0.0  ;;  %v2002_v11 = vadd.f32 %v4213_v0, %v1870_v5  ;;  %v1405_v12 = vpop.f32.mrf.mxu2 }
 0x17c   : > { %v1734_v13 = vpop.f32.mrf.mxu3 }
 0x17d   : > { %v2321_v17 = vpack.c.bf16 %v2193_v10, %v2193_v10  ;;  %v2130_v18 = vmax.f32 %v2002_v11, 0.0  ;;  %v1735_v19 = vadd.f32 %v1734_v13, %v1405_v12  ;;  %v1248_v20 = vpop.f32.mrf.mxu0 }
 0x17e   : > { %v1577_v22 = vpop.f32.mrf.mxu1 }
 0x17f   : > { %2450 = vst.msk [vmem:[%s4223_s29 + $0x148] sm:$0xf] %vm2367_vm0, %v2321_v17  ;;  %v2258_v23 = vpack.c.bf16 %v2130_v18, %v2130_v18  ;;  %v1934_v24 = vmul.f32 %v4208_v59, %v1735_v19  ;;  %v1578_v25 = vadd.f32 %v1577_v22, %v1248_v20  ;;  %v3078_v18 = vld [vmem:[%s4079_s11 + $0x140] sm:$0xf]  ;;  %v3553_v19 = vld [vmem:[%s4079_s11 + $0x144] sm:$0xf0] }
 0x180   : > { %1287 = vmatmul.bf16.gmra.mxu0 %v3063_v14  ;;  %1447 = vmatmul.bf16.gmra.mxu2 %v3319_v15  ;;  %v3334_v20 = vld [vmem:[%s4079_s11 + $0x340] sm:$0xf] }
 0x181   : > { %2387 = vst.msk [vmem:[%s4223_s29 + $0x4c] sm:$0xf] %vm2367_vm0, %v2258_v23  ;;  %v2066_v26 = vadd.f32 %v4213_v0, %v1934_v24  ;;  %v1871_v27 = vmul.f32 %v4208_v59, %v1578_v25  ;;  %1616 = vmatmul.bf16.gmra.mxu1 %v3067_v16  ;;  %1776 = vmatmul.bf16.gmra.mxu3 %v3323_v21  ;;  %v3617_v21 = vld [vmem:[%s4079_s11 + $0x344] sm:$0xf0]  ;;  %v3552_v24 = vld [vmem:[%s4079_s11 + $0x144] sm:$0xf] }
 0x182   : > { %v3080_v25 = vld [vmem:[%s4079_s11 + $0x148] sm:$0xf0] }
 0x183   : > { %v2194_v28 = vmax.f32 %v2066_v26, 0.0  ;;  %v2003_v29 = vadd.f32 %v4213_v0, %v1871_v27  ;;  %v1408_v30 = vpop.f32.mrf.mxu2  ;;  %v3616_v26 = vld [vmem:[%s4079_s11 + $0x344] sm:$0xf]  ;;  %v3336_v27 = vld [vmem:[%s4079_s11 + $0x348] sm:$0xf0] }
 0x184   : > { %v1737_v31 = vpop.f32.mrf.mxu3 }
 0x185   : > { %v2322_v32 = vpack.c.bf16 %v2194_v28, %v2194_v28  ;;  %v2131_v33 = vmax.f32 %v2003_v29, 0.0  ;;  %v1738_v34 = vadd.f32 %v1737_v31, %v1408_v30  ;;  %v1250_v35 = vpop.f32.mrf.mxu0 }
 0x186   : > { %v1579_v36 = vpop.f32.mrf.mxu1 }
 0x187   : > { %2451 = vst.msk [vmem:[%s4223_s29 + $0x14c] sm:$0xf] %vm2367_vm0, %v2322_v32  ;;  %v2259_v37 = vpack.c.bf16 %v2131_v33, %v2131_v33  ;;  %v1935_v38 = vmul.f32 %v4208_v59, %v1738_v34  ;;  %v1580_v39 = vadd.f32 %v1579_v36, %v1250_v35  ;;  %v3079_v32 = vor.u32 %v3553_v19, %v3078_v18 }
 0x188   : > { %v3335_v33 = vor.u32 %v3617_v21, %v3334_v20  ;;  %v3083_v34 = vor.u32 %v3552_v24, %v3080_v25 }
 0x189   : > { %2388 = vst.msk [vmem:[%s4223_s29 + $0x50] sm:$0xf] %vm2367_vm0, %v2259_v37  ;;  %v2067_v44 = vadd.f32 %v4213_v0, %v1935_v38  ;;  %v1872_v45 = vmul.f32 %v4208_v59, %v1580_v39  ;;  %v3339_v39 = vor.u32 %v3616_v26, %v3336_v27 }
 0x18b   : > { %v2195_v50 = vmax.f32 %v2067_v44, 0.0  ;;  %v2004_v51 = vadd.f32 %v4213_v0, %v1872_v45  ;;  %v1410_v52 = vpop.f32.mrf.mxu2 }
 0x18c   : > { %v1739_v53 = vpop.f32.mrf.mxu3 }
 0x18d   : > { %v2323_v57 = vpack.c.bf16 %v2195_v50, %v2195_v50  ;;  %v2132_v58 = vmax.f32 %v2004_v51, 0.0  ;;  %v1740_v60 = vadd.f32 %v1739_v53, %v1410_v52  ;;  %v1253_v61 = vpop.f32.mrf.mxu0 }
 0x18e   : > { %v1582_v59 = vpop.f32.mrf.mxu1 }
 0x18f   : > { %2452 = vst.msk [vmem:[%s4223_s29 + $0x150] sm:$0xf] %vm2367_vm0, %v2323_v57  ;;  %v2260_v63 = vpack.c.bf16 %v2132_v58, %v2132_v58  ;;  %v1936_v0 = vmul.f32 %v4479_v1, %v1740_v60  ;;  %v1583_v2 = vadd.f32 %v1582_v59, %v1253_v61  ;;  %v3086_v58 = vld [vmem:[%s4079_s11 + $0x150] sm:$0xf]  ;;  %v3555_v60 = vld [vmem:[%s4079_s11 + $0x154] sm:$0xf0] }
 0x190   : > { %1292 = vmatmul.bf16.gmra.mxu0 %v3071_v54  ;;  %1452 = vmatmul.bf16.gmra.mxu2 %v3327_v55  ;;  %v3342_v61 = vld [vmem:[%s4079_s11 + $0x350] sm:$0xf] }
 0x191   : > { %2389 = vst.msk [vmem:[%s4223_s29 + $0x54] sm:$0xf] %vm2367_vm0, %v2260_v63  ;;  %v2068_v4 = vadd.f32 %v4487_v3, %v1936_v0  ;;  %v1873_v5 = vmul.f32 %v4479_v1, %v1583_v2  ;;  %1621 = vmatmul.bf16.gmra.mxu1 %v3075_v56  ;;  %1781 = vmatmul.bf16.gmra.mxu3 %v3331_v62  ;;  %v3619_v62 = vld [vmem:[%s4079_s11 + $0x354] sm:$0xf0]  ;;  %v3554_v0 = vld [vmem:[%s4079_s11 + $0x154] sm:$0xf] }
 0x192   : > { %v3088_v2 = vld [vmem:[%s4079_s11 + $0x158] sm:$0xf0] }
 0x193   : > { %v2196_v6 = vmax.f32 %v2068_v4, 0.0  ;;  %v2005_v7 = vadd.f32 %v4487_v3, %v1873_v5  ;;  %v1413_v8 = vpop.f32.mrf.mxu2  ;;  %v3618_v4 = vld [vmem:[%s4079_s11 + $0x354] sm:$0xf]  ;;  %v3344_v5 = vld [vmem:[%s4079_s11 + $0x358] sm:$0xf0] }
 0x194   : > { %v1742_v9 = vpop.f32.mrf.mxu3 }
 0x195   : > { %v2324_v10 = vpack.c.bf16 %v2196_v6, %v2196_v6  ;;  %v2133_v11 = vmax.f32 %v2005_v7, 0.0  ;;  %v1743_v12 = vadd.f32 %v1742_v9, %v1413_v8  ;;  %v1255_v13 = vpop.f32.mrf.mxu0 }
 0x196   : > { %v1584_v14 = vpop.f32.mrf.mxu1 }
 0x197   : > { %2453 = vst.msk [vmem:[%s4223_s29 + $0x154] sm:$0xf] %vm2367_vm0, %v2324_v10  ;;  %v2261_v15 = vpack.c.bf16 %v2133_v11, %v2133_v11  ;;  %v1937_v16 = vmul.f32 %v4479_v1, %v1743_v12  ;;  %v1585_v17 = vadd.f32 %v1584_v14, %v1255_v13  ;;  %v3087_v10 = vor.u32 %v3555_v60, %v3086_v58 }
 0x198   : > { %v3343_v11 = vor.u32 %v3619_v62, %v3342_v61  ;;  %v3091_v12 = vor.u32 %v3554_v0, %v3088_v2 }
 0x199   : > { %2390 = vst.msk [vmem:[%s4223_s29 + $0x58] sm:$0xf] %vm2367_vm0, %v2261_v15  ;;  %v2069_v22 = vadd.f32 %v4487_v3, %v1937_v16  ;;  %v1874_v23 = vmul.f32 %v4479_v1, %v1585_v17  ;;  %v3347_v17 = vor.u32 %v3618_v4, %v3344_v5 }
 0x19b   : > { %v2197_v28 = vmax.f32 %v2069_v22, 0.0  ;;  %v2006_v29 = vadd.f32 %v4487_v3, %v1874_v23  ;;  %v1415_v30 = vpop.f32.mrf.mxu2 }
 0x19c   : > { %v1744_v31 = vpop.f32.mrf.mxu3 }
 0x19d   : > { %v2325_v35 = vpack.c.bf16 %v2197_v28, %v2197_v28  ;;  %v2134_v36 = vmax.f32 %v2006_v29, 0.0  ;;  %v1745_v37 = vadd.f32 %v1744_v31, %v1415_v30  ;;  %v1258_v38 = vpop.f32.mrf.mxu0 }
 0x19e   : > { %v1587_v40 = vpop.f32.mrf.mxu1 }
 0x19f   : > { %2454 = vst.msk [vmem:[%s4223_s29 + $0x158] sm:$0xf] %vm2367_vm0, %v2325_v35  ;;  %v2262_v41 = vpack.c.bf16 %v2134_v36, %v2134_v36  ;;  %v1938_v42 = vmul.f32 %v4479_v1, %v1745_v37  ;;  %v1588_v43 = vadd.f32 %v1587_v40, %v1258_v38  ;;  %v3094_v36 = vld [vmem:[%s4079_s11 + $0x160] sm:$0xf]  ;;  %v3557_v37 = vld [vmem:[%s4079_s11 + $0x164] sm:$0xf0] }
 0x1a0   : > { %1297 = vmatmul.bf16.gmra.mxu0 %v3079_v32  ;;  %1457 = vmatmul.bf16.gmra.mxu2 %v3335_v33  ;;  %v3350_v38 = vld [vmem:[%s4079_s11 + $0x360] sm:$0xf] }
 0x1a1   : > { %2391 = vst.msk [vmem:[%s4223_s29 + $0x5c] sm:$0xf] %vm2367_vm0, %v2262_v41  ;;  %v2070_v44 = vadd.f32 %v4487_v3, %v1938_v42  ;;  %v1875_v45 = vmul.f32 %v4479_v1, %v1588_v43  ;;  %1626 = vmatmul.bf16.gmra.mxu1 %v3083_v34  ;;  %1786 = vmatmul.bf16.gmra.mxu3 %v3339_v39  ;;  %v3621_v39 = vld [vmem:[%s4079_s11 + $0x364] sm:$0xf0]  ;;  %v3556_v42 = vld [vmem:[%s4079_s11 + $0x164] sm:$0xf] }
 0x1a2   : > { %v3096_v43 = vld [vmem:[%s4079_s11 + $0x168] sm:$0xf0] }
 0x1a3   : > { %v2198_v46 = vmax.f32 %v2070_v44, 0.0  ;;  %v2007_v47 = vadd.f32 %v4487_v3, %v1875_v45  ;;  %v1418_v48 = vpop.f32.mrf.mxu2  ;;  %v3620_v44 = vld [vmem:[%s4079_s11 + $0x364] sm:$0xf]  ;;  %v3352_v45 = vld [vmem:[%s4079_s11 + $0x368] sm:$0xf0] }
 0x1a4   : > { %v1747_v49 = vpop.f32.mrf.mxu3 }
 0x1a5   : > { %v2326_v50 = vpack.c.bf16 %v2198_v46, %v2198_v46  ;;  %v2135_v51 = vmax.f32 %v2007_v47, 0.0  ;;  %v1748_v52 = vadd.f32 %v1747_v49, %v1418_v48  ;;  %v1260_v53 = vpop.f32.mrf.mxu0 }
 0x1a6   : > { %v1589_v54 = vpop.f32.mrf.mxu1 }
 0x1a7   : > { %2455 = vst.msk [vmem:[%s4223_s29 + $0x15c] sm:$0xf] %vm2367_vm0, %v2326_v50  ;;  %v2263_v55 = vpack.c.bf16 %v2135_v51, %v2135_v51  ;;  %v1939_v56 = vmul.f32 %v4479_v1, %v1748_v52  ;;  %v1590_v57 = vadd.f32 %v1589_v54, %v1260_v53  ;;  %v3095_v50 = vor.u32 %v3557_v37, %v3094_v36 }
 0x1a8   : > { %v3351_v51 = vor.u32 %v3621_v39, %v3350_v38  ;;  %v3099_v52 = vor.u32 %v3556_v42, %v3096_v43 }
 0x1a9   : > { %2392 = vst.msk [vmem:[%s4223_s29 + $0x60] sm:$0xf] %vm2367_vm0, %v2263_v55  ;;  %v2071_v59 = vadd.f32 %v4487_v3, %v1939_v56  ;;  %v1876_v63 = vmul.f32 %v4479_v1, %v1590_v57  ;;  %v3355_v57 = vor.u32 %v3620_v44, %v3352_v45 }
 0x1ab   : > { %v2199_v6 = vmax.f32 %v2071_v59, 0.0  ;;  %v2008_v7 = vadd.f32 %v4487_v3, %v1876_v63  ;;  %v1420_v8 = vpop.f32.mrf.mxu2 }
 0x1ac   : > { %v1749_v9 = vpop.f32.mrf.mxu3 }
 0x1ad   : > { %v2327_v13 = vpack.c.bf16 %v2199_v6, %v2199_v6  ;;  %v2136_v14 = vmax.f32 %v2008_v7, 0.0  ;;  %v1750_v15 = vadd.f32 %v1749_v9, %v1420_v8  ;;  %v1263_v16 = vpop.f32.mrf.mxu0 }
 0x1ae   : > { %v1592_v18 = vpop.f32.mrf.mxu1 }
 0x1af   : > { %2456 = vst.msk [vmem:[%s4223_s29 + $0x160] sm:$0xf] %vm2367_vm0, %v2327_v13  ;;  %v2264_v19 = vpack.c.bf16 %v2136_v14, %v2136_v14  ;;  %v1940_v20 = vmul.f32 %v4479_v1, %v1750_v15  ;;  %v1593_v21 = vadd.f32 %v1592_v18, %v1263_v16  ;;  %v3102_v14 = vld [vmem:[%s4079_s11 + $0x170] sm:$0xf]  ;;  %v3559_v15 = vld [vmem:[%s4079_s11 + $0x174] sm:$0xf0] }
 0x1b0   : > { %1302 = vmatmul.bf16.gmra.mxu0 %v3087_v10  ;;  %1462 = vmatmul.bf16.gmra.mxu2 %v3343_v11  ;;  %v3358_v16 = vld [vmem:[%s4079_s11 + $0x370] sm:$0xf] }
 0x1b1   : > { %2393 = vst.msk [vmem:[%s4223_s29 + $0x64] sm:$0xf] %vm2367_vm0, %v2264_v19  ;;  %v2072_v22 = vadd.f32 %v4487_v3, %v1940_v20  ;;  %v1877_v23 = vmul.f32 %v4479_v1, %v1593_v21  ;;  %1631 = vmatmul.bf16.gmra.mxu1 %v3091_v12  ;;  %1791 = vmatmul.bf16.gmra.mxu3 %v3347_v17  ;;  %v3623_v17 = vld [vmem:[%s4079_s11 + $0x374] sm:$0xf0]  ;;  %v3558_v20 = vld [vmem:[%s4079_s11 + $0x174] sm:$0xf] }
 0x1b2   : > { %v3104_v21 = vld [vmem:[%s4079_s11 + $0x178] sm:$0xf0] }
 0x1b3   : > { %v2200_v24 = vmax.f32 %v2072_v22, 0.0  ;;  %v2009_v25 = vadd.f32 %v4487_v3, %v1877_v23  ;;  %v1423_v26 = vpop.f32.mrf.mxu2  ;;  %v3622_v22 = vld [vmem:[%s4079_s11 + $0x374] sm:$0xf]  ;;  %v3360_v23 = vld [vmem:[%s4079_s11 + $0x378] sm:$0xf0] }
 0x1b4   : > { %v1752_v27 = vpop.f32.mrf.mxu3 }
 0x1b5   : > { %v2328_v28 = vpack.c.bf16 %v2200_v24, %v2200_v24  ;;  %v2137_v29 = vmax.f32 %v2009_v25, 0.0  ;;  %v1753_v30 = vadd.f32 %v1752_v27, %v1423_v26  ;;  %v1265_v31 = vpop.f32.mrf.mxu0 }
 0x1b6   : > { %v1594_v32 = vpop.f32.mrf.mxu1 }
 0x1b7   : > { %2457 = vst.msk [vmem:[%s4223_s29 + $0x164] sm:$0xf] %vm2367_vm0, %v2328_v28  ;;  %v2265_v33 = vpack.c.bf16 %v2137_v29, %v2137_v29  ;;  %v1941_v34 = vmul.f32 %v4479_v1, %v1753_v30  ;;  %v1595_v35 = vadd.f32 %v1594_v32, %v1265_v31  ;;  %v3103_v28 = vor.u32 %v3559_v15, %v3102_v14 }
 0x1b8   : > { %v3359_v29 = vor.u32 %v3623_v17, %v3358_v16  ;;  %v3107_v30 = vor.u32 %v3558_v20, %v3104_v21 }
 0x1b9   : > { %2394 = vst.msk [vmem:[%s4223_s29 + $0x68] sm:$0xf] %vm2367_vm0, %v2265_v33  ;;  %v2073_v40 = vadd.f32 %v4487_v3, %v1941_v34  ;;  %v1878_v41 = vmul.f32 %v4479_v1, %v1595_v35  ;;  %v3363_v35 = vor.u32 %v3622_v22, %v3360_v23 }
 0x1bb   : > { %v2201_v46 = vmax.f32 %v2073_v40, 0.0  ;;  %v2010_v47 = vadd.f32 %v4487_v3, %v1878_v41  ;;  %v1425_v48 = vpop.f32.mrf.mxu2 }
 0x1bc   : > { %v1754_v49 = vpop.f32.mrf.mxu3 }
 0x1bd   : > { %v2329_v53 = vpack.c.bf16 %v2201_v46, %v2201_v46  ;;  %v2138_v54 = vmax.f32 %v2010_v47, 0.0  ;;  %v1755_v55 = vadd.f32 %v1754_v49, %v1425_v48  ;;  %v1268_v56 = vpop.f32.mrf.mxu0 }
 0x1be   : > { %v1597_v58 = vpop.f32.mrf.mxu1 }
 0x1bf   : > { %2458 = vst.msk [vmem:[%s4223_s29 + $0x168] sm:$0xf] %vm2367_vm0, %v2329_v53  ;;  %v2266_v60 = vpack.c.bf16 %v2138_v54, %v2138_v54  ;;  %v1942_v61 = vmul.f32 %v4479_v1, %v1755_v55  ;;  %v1598_v62 = vadd.f32 %v1597_v58, %v1268_v56  ;;  %v3110_v54 = vld [vmem:[%s4079_s11 + $0x180] sm:$0xf]  ;;  %v3561_v55 = vld [vmem:[%s4079_s11 + $0x184] sm:$0xf0] }
 0x1c0   : > { %1307 = vmatmul.bf16.gmra.mxu0 %v3095_v50  ;;  %1467 = vmatmul.bf16.gmra.mxu2 %v3351_v51  ;;  %v3366_v56 = vld [vmem:[%s4079_s11 + $0x380] sm:$0xf] }
 0x1c1   : > { %2395 = vst.msk [vmem:[%s4223_s29 + $0x6c] sm:$0xf] %vm2367_vm0, %v2266_v60  ;;  %v2074_v59 = vadd.f32 %v4487_v3, %v1942_v61  ;;  %v1879_v63 = vmul.f32 %v4479_v1, %v1598_v62  ;;  %1636 = vmatmul.bf16.gmra.mxu1 %v3099_v52  ;;  %1796 = vmatmul.bf16.gmra.mxu3 %v3355_v57  ;;  %v3625_v57 = vld [vmem:[%s4079_s11 + $0x384] sm:$0xf0]  ;;  %v3560_v61 = vld [vmem:[%s4079_s11 + $0x184] sm:$0xf] }
 0x1c2   : > { %v3112_v62 = vld [vmem:[%s4079_s11 + $0x188] sm:$0xf0] }
 0x1c3   : > { %v2202_v0 = vmax.f32 %v2074_v59, 0.0  ;;  %v2011_v2 = vadd.f32 %v4487_v3, %v1879_v63  ;;  %v1428_v4 = vpop.f32.mrf.mxu2  ;;  %v3624_v59 = vld [vmem:[%s4079_s11 + $0x384] sm:$0xf]  ;;  %v3368_v63 = vld [vmem:[%s4079_s11 + $0x388] sm:$0xf0] }
 0x1c4   : > { %v1757_v5 = vpop.f32.mrf.mxu3 }
 0x1c5   : > { %v2330_v6 = vpack.c.bf16 %v2202_v0, %v2202_v0  ;;  %v2139_v7 = vmax.f32 %v2011_v2, 0.0  ;;  %v1758_v8 = vadd.f32 %v1757_v5, %v1428_v4  ;;  %v1270_v9 = vpop.f32.mrf.mxu0 }
 0x1c6   : > { %v1599_v10 = vpop.f32.mrf.mxu1 }
 0x1c7   : > { %2459 = vst.msk [vmem:[%s4223_s29 + $0x16c] sm:$0xf] %vm2367_vm0, %v2330_v6  ;;  %v2267_v11 = vpack.c.bf16 %v2139_v7, %v2139_v7  ;;  %v1943_v12 = vmul.f32 %v4479_v1, %v1758_v8  ;;  %v1600_v13 = vadd.f32 %v1599_v10, %v1270_v9  ;;  %v3111_v6 = vor.u32 %v3561_v55, %v3110_v54 }
 0x1c8   : > { %v3367_v7 = vor.u32 %v3625_v57, %v3366_v56  ;;  %v3115_v8 = vor.u32 %v3560_v61, %v3112_v62 }
 0x1c9   : > { %2396 = vst.msk [vmem:[%s4223_s29 + $0x70] sm:$0xf] %vm2367_vm0, %v2267_v11  ;;  %v2075_v18 = vadd.f32 %v4487_v3, %v1943_v12  ;;  %v1880_v19 = vmul.f32 %v4479_v1, %v1600_v13  ;;  %v3371_v13 = vor.u32 %v3624_v59, %v3368_v63 }
 0x1cb   : > { %v2203_v24 = vmax.f32 %v2075_v18, 0.0  ;;  %v2012_v25 = vadd.f32 %v4487_v3, %v1880_v19  ;;  %v1430_v26 = vpop.f32.mrf.mxu2 }
 0x1cc   : > { %v1759_v27 = vpop.f32.mrf.mxu3 }
 0x1cd   : > { %v2331_v31 = vpack.c.bf16 %v2203_v24, %v2203_v24  ;;  %v2140_v32 = vmax.f32 %v2012_v25, 0.0  ;;  %v1760_v33 = vadd.f32 %v1759_v27, %v1430_v26  ;;  %v1273_v34 = vpop.f32.mrf.mxu0 }
 0x1ce   : > { %v1602_v36 = vpop.f32.mrf.mxu1 }
 0x1cf   : > { %2460 = vst.msk [vmem:[%s4223_s29 + $0x170] sm:$0xf] %vm2367_vm0, %v2331_v31  ;;  %v2268_v37 = vpack.c.bf16 %v2140_v32, %v2140_v32  ;;  %v1944_v38 = vmul.f32 %v4479_v1, %v1760_v33  ;;  %v1603_v39 = vadd.f32 %v1602_v36, %v1273_v34  ;;  %v3118_v32 = vld [vmem:[%s4079_s11 + $0x190] sm:$0xf]  ;;  %v3563_v33 = vld [vmem:[%s4079_s11 + $0x194] sm:$0xf0] }
 0x1d0   : > { %1312 = vmatmul.bf16.gmra.mxu0 %v3103_v28  ;;  %1472 = vmatmul.bf16.gmra.mxu2 %v3359_v29  ;;  %v3374_v34 = vld [vmem:[%s4079_s11 + $0x390] sm:$0xf] }
 0x1d1   : > { %2397 = vst.msk [vmem:[%s4223_s29 + $0x74] sm:$0xf] %vm2367_vm0, %v2268_v37  ;;  %v2076_v40 = vadd.f32 %v4487_v3, %v1944_v38  ;;  %v1881_v41 = vmul.f32 %v4479_v1, %v1603_v39  ;;  %1641 = vmatmul.bf16.gmra.mxu1 %v3107_v30  ;;  %1801 = vmatmul.bf16.gmra.mxu3 %v3363_v35  ;;  %v3627_v35 = vld [vmem:[%s4079_s11 + $0x394] sm:$0xf0]  ;;  %v3562_v38 = vld [vmem:[%s4079_s11 + $0x194] sm:$0xf] }
 0x1d2   : > { %v3120_v39 = vld [vmem:[%s4079_s11 + $0x198] sm:$0xf0] }
 0x1d3   : > { %v2204_v42 = vmax.f32 %v2076_v40, 0.0  ;;  %v2013_v43 = vadd.f32 %v4487_v3, %v1881_v41  ;;  %v1433_v44 = vpop.f32.mrf.mxu2  ;;  %v3626_v40 = vld [vmem:[%s4079_s11 + $0x394] sm:$0xf]  ;;  %v3376_v41 = vld [vmem:[%s4079_s11 + $0x398] sm:$0xf0] }
 0x1d4   : > { %v1762_v45 = vpop.f32.mrf.mxu3 }
 0x1d5   : > { %v2332_v46 = vpack.c.bf16 %v2204_v42, %v2204_v42  ;;  %v2141_v47 = vmax.f32 %v2013_v43, 0.0  ;;  %v1763_v48 = vadd.f32 %v1762_v45, %v1433_v44  ;;  %v1275_v49 = vpop.f32.mrf.mxu0 }
 0x1d6   : > { %v1604_v50 = vpop.f32.mrf.mxu1 }
 0x1d7   : > { %2461 = vst.msk [vmem:[%s4223_s29 + $0x174] sm:$0xf] %vm2367_vm0, %v2332_v46  ;;  %v2269_v51 = vpack.c.bf16 %v2141_v47, %v2141_v47  ;;  %v1945_v52 = vmul.f32 %v4479_v1, %v1763_v48  ;;  %v1605_v53 = vadd.f32 %v1604_v50, %v1275_v49  ;;  %v3119_v46 = vor.u32 %v3563_v33, %v3118_v32 }
 0x1d8   : > { %v3375_v47 = vor.u32 %v3627_v35, %v3374_v34  ;;  %v3123_v48 = vor.u32 %v3562_v38, %v3120_v39 }
 0x1d9   : > { %2398 = vst.msk [vmem:[%s4223_s29 + $0x78] sm:$0xf] %vm2367_vm0, %v2269_v51  ;;  %v2077_v58 = vadd.f32 %v4487_v3, %v1945_v52  ;;  %v1882_v60 = vmul.f32 %v4479_v1, %v1605_v53  ;;  %v3379_v53 = vor.u32 %v3626_v40, %v3376_v41 }
 0x1db   : > { %v2205_v0 = vmax.f32 %v2077_v58, 0.0  ;;  %v2014_v2 = vadd.f32 %v4487_v3, %v1882_v60  ;;  %v1435_v4 = vpop.f32.mrf.mxu2 }
 0x1dc   : > { %v1764_v5 = vpop.f32.mrf.mxu3 }
 0x1dd   : > { %v2333_v9 = vpack.c.bf16 %v2205_v0, %v2205_v0  ;;  %v2142_v10 = vmax.f32 %v2014_v2, 0.0  ;;  %v1765_v11 = vadd.f32 %v1764_v5, %v1435_v4  ;;  %v1278_v12 = vpop.f32.mrf.mxu0 }
 0x1de   : > { %v1607_v14 = vpop.f32.mrf.mxu1 }
 0x1df   : > { %2462 = vst.msk [vmem:[%s4223_s29 + $0x178] sm:$0xf] %vm2367_vm0, %v2333_v9  ;;  %v2270_v15 = vpack.c.bf16 %v2142_v10, %v2142_v10  ;;  %v1946_v16 = vmul.f32 %v4479_v1, %v1765_v11  ;;  %v1608_v17 = vadd.f32 %v1607_v14, %v1278_v12  ;;  %v3126_v10 = vld [vmem:[%s4079_s11 + $0x1a0] sm:$0xf]  ;;  %v3565_v11 = vld [vmem:[%s4079_s11 + $0x1a4] sm:$0xf0] }
 0x1e0   : > { %1317 = vmatmul.bf16.gmra.mxu0 %v3111_v6  ;;  %1477 = vmatmul.bf16.gmra.mxu2 %v3367_v7  ;;  %v3382_v12 = vld [vmem:[%s4079_s11 + $0x3a0] sm:$0xf] }
 0x1e1   : > { %2399 = vst.msk [vmem:[%s4223_s29 + $0x7c] sm:$0xf] %vm2367_vm0, %v2270_v15  ;;  %v2078_v18 = vadd.f32 %v4487_v3, %v1946_v16  ;;  %v1883_v19 = vmul.f32 %v4479_v1, %v1608_v17  ;;  %1646 = vmatmul.bf16.gmra.mxu1 %v3115_v8  ;;  %1806 = vmatmul.bf16.gmra.mxu3 %v3371_v13  ;;  %v3629_v13 = vld [vmem:[%s4079_s11 + $0x3a4] sm:$0xf0]  ;;  %v3564_v16 = vld [vmem:[%s4079_s11 + $0x1a4] sm:$0xf] }
 0x1e2   : > { %v3128_v17 = vld [vmem:[%s4079_s11 + $0x1a8] sm:$0xf0] }
 0x1e3   : > { %v2206_v20 = vmax.f32 %v2078_v18, 0.0  ;;  %v2015_v21 = vadd.f32 %v4487_v3, %v1883_v19  ;;  %v1438_v22 = vpop.f32.mrf.mxu2  ;;  %v3628_v18 = vld [vmem:[%s4079_s11 + $0x3a4] sm:$0xf]  ;;  %v3384_v19 = vld [vmem:[%s4079_s11 + $0x3a8] sm:$0xf0] }
 0x1e4   : > { %v1767_v23 = vpop.f32.mrf.mxu3 }
 0x1e5   : > { %v2334_v24 = vpack.c.bf16 %v2206_v20, %v2206_v20  ;;  %v2143_v25 = vmax.f32 %v2015_v21, 0.0  ;;  %v1768_v26 = vadd.f32 %v1767_v23, %v1438_v22  ;;  %v1280_v27 = vpop.f32.mrf.mxu0 }
 0x1e6   : > { %v1609_v28 = vpop.f32.mrf.mxu1 }
 0x1e7   : > { %2463 = vst.msk [vmem:[%s4223_s29 + $0x17c] sm:$0xf] %vm2367_vm0, %v2334_v24  ;;  %v2271_v29 = vpack.c.bf16 %v2143_v25, %v2143_v25  ;;  %v1947_v30 = vmul.f32 %v4479_v1, %v1768_v26  ;;  %v1610_v31 = vadd.f32 %v1609_v28, %v1280_v27  ;;  %v3127_v24 = vor.u32 %v3565_v11, %v3126_v10 }
 0x1e8   : > { %v3383_v25 = vor.u32 %v3629_v13, %v3382_v12  ;;  %v3131_v26 = vor.u32 %v3564_v16, %v3128_v17 }
 0x1e9   : > { %2400 = vst.msk [vmem:[%s4223_s29 + $0x80] sm:$0xf] %vm2367_vm0, %v2271_v29  ;;  %v2079_v36 = vadd.f32 %v4487_v3, %v1947_v30  ;;  %v1884_v37 = vmul.f32 %v4479_v1, %v1610_v31  ;;  %v3387_v31 = vor.u32 %v3628_v18, %v3384_v19 }
 0x1eb   : > { %v2207_v42 = vmax.f32 %v2079_v36, 0.0  ;;  %v2016_v43 = vadd.f32 %v4487_v3, %v1884_v37  ;;  %v1440_v44 = vpop.f32.mrf.mxu2 }
 0x1ec   : > { %v1769_v45 = vpop.f32.mrf.mxu3 }
 0x1ed   : > { %v2335_v49 = vpack.c.bf16 %v2207_v42, %v2207_v42  ;;  %v2144_v50 = vmax.f32 %v2016_v43, 0.0  ;;  %v1770_v51 = vadd.f32 %v1769_v45, %v1440_v44  ;;  %v1283_v52 = vpop.f32.mrf.mxu0 }
 0x1ee   : > { %v1612_v54 = vpop.f32.mrf.mxu1 }
 0x1ef   : > { %2464 = vst.msk [vmem:[%s4223_s29 + $0x180] sm:$0xf] %vm2367_vm0, %v2335_v49  ;;  %v2272_v55 = vpack.c.bf16 %v2144_v50, %v2144_v50  ;;  %v1948_v56 = vmul.f32 %v4479_v1, %v1770_v51  ;;  %v1613_v57 = vadd.f32 %v1612_v54, %v1283_v52  ;;  %v3134_v50 = vld [vmem:[%s4079_s11 + $0x1b0] sm:$0xf]  ;;  %v3567_v51 = vld [vmem:[%s4079_s11 + $0x1b4] sm:$0xf0] }
 0x1f0   : > { %1322 = vmatmul.bf16.gmra.mxu0 %v3119_v46  ;;  %1482 = vmatmul.bf16.gmra.mxu2 %v3375_v47  ;;  %v3390_v52 = vld [vmem:[%s4079_s11 + $0x3b0] sm:$0xf] }
 0x1f1   : > { %2401 = vst.msk [vmem:[%s4223_s29 + $0x84] sm:$0xf] %vm2367_vm0, %v2272_v55  ;;  %v2080_v58 = vadd.f32 %v4487_v3, %v1948_v56  ;;  %v1885_v60 = vmul.f32 %v4479_v1, %v1613_v57  ;;  %1651 = vmatmul.bf16.gmra.mxu1 %v3123_v48  ;;  %1811 = vmatmul.bf16.gmra.mxu3 %v3379_v53  ;;  %v3631_v53 = vld [vmem:[%s4079_s11 + $0x3b4] sm:$0xf0]  ;;  %v3566_v56 = vld [vmem:[%s4079_s11 + $0x1b4] sm:$0xf] }
 0x1f2   : > { %v3136_v57 = vld [vmem:[%s4079_s11 + $0x1b8] sm:$0xf0] }
 0x1f3   : > { %v2208_v61 = vmax.f32 %v2080_v58, 0.0  ;;  %v2017_v62 = vadd.f32 %v4487_v3, %v1885_v60  ;;  %v1443_v59 = vpop.f32.mrf.mxu2  ;;  %v3630_v58 = vld [vmem:[%s4079_s11 + $0x3b4] sm:$0xf]  ;;  %v3392_v60 = vld [vmem:[%s4079_s11 + $0x3b8] sm:$0xf0] }
 0x1f4   : > { %v1772_v63 = vpop.f32.mrf.mxu3 }
 0x1f5   : > { %v2336_v0 = vpack.c.bf16 %v2208_v61, %v2208_v61  ;;  %v2145_v2 = vmax.f32 %v2017_v62, 0.0  ;;  %v1773_v4 = vadd.f32 %v1772_v63, %v1443_v59  ;;  %v1285_v5 = vpop.f32.mrf.mxu0 }
 0x1f6   : > { %v1614_v6 = vpop.f32.mrf.mxu1 }
 0x1f7   : > { %2465 = vst.msk [vmem:[%s4223_s29 + $0x184] sm:$0xf] %vm2367_vm0, %v2336_v0  ;;  %v2273_v7 = vpack.c.bf16 %v2145_v2, %v2145_v2  ;;  %v1949_v8 = vmul.f32 %v4479_v1, %v1773_v4  ;;  %v1615_v9 = vadd.f32 %v1614_v6, %v1285_v5  ;;  %v3135_v0 = vor.u32 %v3567_v51, %v3134_v50 }
 0x1f8   : > { %v3391_v2 = vor.u32 %v3631_v53, %v3390_v52  ;;  %v3139_v4 = vor.u32 %v3566_v56, %v3136_v57 }
 0x1f9   : > { %2402 = vst.msk [vmem:[%s4223_s29 + $0x88] sm:$0xf] %vm2367_vm0, %v2273_v7  ;;  %v2081_v14 = vadd.f32 %v4487_v3, %v1949_v8  ;;  %v1886_v15 = vmul.f32 %v4479_v1, %v1615_v9  ;;  %v3395_v9 = vor.u32 %v3630_v58, %v3392_v60 }
 0x1fb   : > { %v2209_v20 = vmax.f32 %v2081_v14, 0.0  ;;  %v2018_v21 = vadd.f32 %v4487_v3, %v1886_v15  ;;  %v1445_v22 = vpop.f32.mrf.mxu2 }
 0x1fc   : > { %v1774_v23 = vpop.f32.mrf.mxu3 }
 0x1fd   : > { %v2337_v27 = vpack.c.bf16 %v2209_v20, %v2209_v20  ;;  %v2146_v28 = vmax.f32 %v2018_v21, 0.0  ;;  %v1775_v29 = vadd.f32 %v1774_v23, %v1445_v22  ;;  %v1288_v30 = vpop.f32.mrf.mxu0 }
 0x1fe   : > { %v1617_v32 = vpop.f32.mrf.mxu1 }
 0x1ff   : > { %2466 = vst.msk [vmem:[%s4223_s29 + $0x188] sm:$0xf] %vm2367_vm0, %v2337_v27  ;;  %v2274_v33 = vpack.c.bf16 %v2146_v28, %v2146_v28  ;;  %v1950_v34 = vmul.f32 %v4479_v1, %v1775_v29  ;;  %v1618_v35 = vadd.f32 %v1617_v32, %v1288_v30  ;;  %v3142_v28 = vld [vmem:[%s4079_s11 + $0x1c0] sm:$0xf]  ;;  %v3569_v29 = vld [vmem:[%s4079_s11 + $0x1c4] sm:$0xf0] }
 0x200   : > { %1327 = vmatmul.bf16.gmra.mxu0 %v3127_v24  ;;  %1487 = vmatmul.bf16.gmra.mxu2 %v3383_v25  ;;  %v3398_v30 = vld [vmem:[%s4079_s11 + $0x3c0] sm:$0xf] }
 0x201   : > { %2403 = vst.msk [vmem:[%s4223_s29 + $0x8c] sm:$0xf] %vm2367_vm0, %v2274_v33  ;;  %v2082_v36 = vadd.f32 %v4487_v3, %v1950_v34  ;;  %v1887_v37 = vmul.f32 %v4479_v1, %v1618_v35  ;;  %1656 = vmatmul.bf16.gmra.mxu1 %v3131_v26  ;;  %1816 = vmatmul.bf16.gmra.mxu3 %v3387_v31  ;;  %v3633_v31 = vld [vmem:[%s4079_s11 + $0x3c4] sm:$0xf0]  ;;  %v3568_v34 = vld [vmem:[%s4079_s11 + $0x1c4] sm:$0xf] }
 0x202   : > { %v3144_v35 = vld [vmem:[%s4079_s11 + $0x1c8] sm:$0xf0] }
 0x203   : > { %v2210_v38 = vmax.f32 %v2082_v36, 0.0  ;;  %v2019_v39 = vadd.f32 %v4487_v3, %v1887_v37  ;;  %v1448_v40 = vpop.f32.mrf.mxu2  ;;  %v3632_v36 = vld [vmem:[%s4079_s11 + $0x3c4] sm:$0xf]  ;;  %v3400_v37 = vld [vmem:[%s4079_s11 + $0x3c8] sm:$0xf0] }
 0x204   : > { %v1777_v41 = vpop.f32.mrf.mxu3 }
 0x205   : > { %v2338_v42 = vpack.c.bf16 %v2210_v38, %v2210_v38  ;;  %v2147_v43 = vmax.f32 %v2019_v39, 0.0  ;;  %v1778_v44 = vadd.f32 %v1777_v41, %v1448_v40  ;;  %v1290_v45 = vpop.f32.mrf.mxu0 }
 0x206   : > { %v1619_v46 = vpop.f32.mrf.mxu1 }
 0x207   : > { %2467 = vst.msk [vmem:[%s4223_s29 + $0x18c] sm:$0xf] %vm2367_vm0, %v2338_v42  ;;  %v2275_v47 = vpack.c.bf16 %v2147_v43, %v2147_v43  ;;  %v1951_v48 = vmul.f32 %v4479_v1, %v1778_v44  ;;  %v1620_v49 = vadd.f32 %v1619_v46, %v1290_v45  ;;  %v3143_v42 = vor.u32 %v3569_v29, %v3142_v28 }
 0x208   : > { %v3399_v43 = vor.u32 %v3633_v31, %v3398_v30  ;;  %v3147_v44 = vor.u32 %v3568_v34, %v3144_v35 }
 0x209   : > { %2404 = vst.msk [vmem:[%s4223_s29 + $0x90] sm:$0xf] %vm2367_vm0, %v2275_v47  ;;  %v2083_v54 = vadd.f32 %v4487_v3, %v1951_v48  ;;  %v1888_v55 = vmul.f32 %v4479_v1, %v1620_v49  ;;  %v3403_v49 = vor.u32 %v3632_v36, %v3400_v37 }
 0x20b   : > { %v2211_v61 = vmax.f32 %v2083_v54, 0.0  ;;  %v2020_v62 = vadd.f32 %v4487_v3, %v1888_v55  ;;  %v1450_v59 = vpop.f32.mrf.mxu2 }
 0x20c   : > { %v1779_v63 = vpop.f32.mrf.mxu3 }
 0x20d   : > { %v2339_v5 = vpack.c.bf16 %v2211_v61, %v2211_v61  ;;  %v2148_v6 = vmax.f32 %v2020_v62, 0.0  ;;  %v1780_v7 = vadd.f32 %v1779_v63, %v1450_v59  ;;  %v1293_v8 = vpop.f32.mrf.mxu0 }
 0x20e   : > { %v1622_v10 = vpop.f32.mrf.mxu1 }
 0x20f   : > { %2468 = vst.msk [vmem:[%s4223_s29 + $0x190] sm:$0xf] %vm2367_vm0, %v2339_v5  ;;  %v2276_v11 = vpack.c.bf16 %v2148_v6, %v2148_v6  ;;  %v1952_v12 = vmul.f32 %v4479_v1, %v1780_v7  ;;  %v1623_v13 = vadd.f32 %v1622_v10, %v1293_v8  ;;  %v3150_v6 = vld [vmem:[%s4079_s11 + $0x1d0] sm:$0xf]  ;;  %v3571_v7 = vld [vmem:[%s4079_s11 + $0x1d4] sm:$0xf0] }
 0x210   : > { %1332 = vmatmul.bf16.gmra.mxu0 %v3135_v0  ;;  %1492 = vmatmul.bf16.gmra.mxu2 %v3391_v2  ;;  %v3406_v8 = vld [vmem:[%s4079_s11 + $0x3d0] sm:$0xf] }
 0x211   : > { %2405 = vst.msk [vmem:[%s4223_s29 + $0x94] sm:$0xf] %vm2367_vm0, %v2276_v11  ;;  %v2084_v14 = vadd.f32 %v4487_v3, %v1952_v12  ;;  %v1889_v15 = vmul.f32 %v4479_v1, %v1623_v13  ;;  %1661 = vmatmul.bf16.gmra.mxu1 %v3139_v4  ;;  %1821 = vmatmul.bf16.gmra.mxu3 %v3395_v9  ;;  %v3635_v9 = vld [vmem:[%s4079_s11 + $0x3d4] sm:$0xf0]  ;;  %v3570_v12 = vld [vmem:[%s4079_s11 + $0x1d4] sm:$0xf] }
 0x212   : > { %v3152_v13 = vld [vmem:[%s4079_s11 + $0x1d8] sm:$0xf0] }
 0x213   : > { %v2212_v16 = vmax.f32 %v2084_v14, 0.0  ;;  %v2021_v17 = vadd.f32 %v4487_v3, %v1889_v15  ;;  %v1453_v18 = vpop.f32.mrf.mxu2  ;;  %v3634_v14 = vld [vmem:[%s4079_s11 + $0x3d4] sm:$0xf]  ;;  %v3408_v15 = vld [vmem:[%s4079_s11 + $0x3d8] sm:$0xf0] }
 0x214   : > { %v1782_v19 = vpop.f32.mrf.mxu3 }
 0x215   : > { %v2340_v20 = vpack.c.bf16 %v2212_v16, %v2212_v16  ;;  %v2149_v21 = vmax.f32 %v2021_v17, 0.0  ;;  %v1783_v22 = vadd.f32 %v1782_v19, %v1453_v18  ;;  %v1295_v23 = vpop.f32.mrf.mxu0 }
 0x216   : > { %v1624_v24 = vpop.f32.mrf.mxu1 }
 0x217   : > { %2469 = vst.msk [vmem:[%s4223_s29 + $0x194] sm:$0xf] %vm2367_vm0, %v2340_v20  ;;  %v2277_v25 = vpack.c.bf16 %v2149_v21, %v2149_v21  ;;  %v1953_v26 = vmul.f32 %v4479_v1, %v1783_v22  ;;  %v1625_v27 = vadd.f32 %v1624_v24, %v1295_v23  ;;  %v3151_v20 = vor.u32 %v3571_v7, %v3150_v6  ;;  %v4753_v7 = vld [vmem:[%s5086_s2] ss:$0 sm:$0xff] }
 0x218   : > { %v3407_v21 = vor.u32 %v3635_v9, %v3406_v8  ;;  %v3155_v22 = vor.u32 %v3570_v12, %v3152_v13  ;;  %v4761_v9 = vld [vmem:[%s5087_s3] ss:$0 sm:$0xff] }
 0x219   : > { %2406 = vst.msk [vmem:[%s4223_s29 + $0x98] sm:$0xf] %vm2367_vm0, %v2277_v25  ;;  %v2085_v32 = vadd.f32 %v4487_v3, %v1953_v26  ;;  %v1890_v33 = vmul.f32 %v4479_v1, %v1625_v27  ;;  %v3411_v27 = vor.u32 %v3634_v14, %v3408_v15 }
 0x21b   : > { %v2213_v38 = vmax.f32 %v2085_v32, 0.0  ;;  %v2022_v39 = vadd.f32 %v4487_v3, %v1890_v33  ;;  %v1455_v40 = vpop.f32.mrf.mxu2 }
 0x21c   : > { %v1784_v41 = vpop.f32.mrf.mxu3 }
 0x21d   : > { %v2341_v45 = vpack.c.bf16 %v2213_v38, %v2213_v38  ;;  %v2150_v46 = vmax.f32 %v2022_v39, 0.0  ;;  %v1785_v47 = vadd.f32 %v1784_v41, %v1455_v40  ;;  %v1298_v48 = vpop.f32.mrf.mxu0 }
 0x21e   : > { %v1627_v50 = vpop.f32.mrf.mxu1 }
 0x21f   : > { %2470 = vst.msk [vmem:[%s4223_s29 + $0x198] sm:$0xf] %vm2367_vm0, %v2341_v45  ;;  %v2278_v51 = vpack.c.bf16 %v2150_v46, %v2150_v46  ;;  %v1954_v52 = vmul.f32 %v4479_v1, %v1785_v47  ;;  %v1628_v53 = vadd.f32 %v1627_v50, %v1298_v48  ;;  %v3158_v46 = vld [vmem:[%s4079_s11 + $0x1e0] sm:$0xf]  ;;  %v3573_v47 = vld [vmem:[%s4079_s11 + $0x1e4] sm:$0xf0] }
 0x220   : > { %1337 = vmatmul.bf16.gmra.mxu0 %v3143_v42  ;;  %1497 = vmatmul.bf16.gmra.mxu2 %v3399_v43  ;;  %v3414_v48 = vld [vmem:[%s4079_s11 + $0x3e0] sm:$0xf] }
 0x221   : > { %2407 = vst.msk [vmem:[%s4223_s29 + $0x9c] sm:$0xf] %vm2367_vm0, %v2278_v51  ;;  %v2086_v54 = vadd.f32 %v4487_v3, %v1954_v52  ;;  %v1891_v55 = vmul.f32 %v4479_v1, %v1628_v53  ;;  %1666 = vmatmul.bf16.gmra.mxu1 %v3147_v44  ;;  %1826 = vmatmul.bf16.gmra.mxu3 %v3403_v49  ;;  %v3637_v49 = vld [vmem:[%s4079_s11 + $0x3e4] sm:$0xf0]  ;;  %v3572_v52 = vld [vmem:[%s4079_s11 + $0x1e4] sm:$0xf] }
 0x222   : > { %v3160_v53 = vld [vmem:[%s4079_s11 + $0x1e8] sm:$0xf0] }
 0x223   : > { %v2214_v56 = vmax.f32 %v2086_v54, 0.0  ;;  %v2023_v57 = vadd.f32 %v4487_v3, %v1891_v55  ;;  %v1458_v58 = vpop.f32.mrf.mxu2  ;;  %v3636_v54 = vld [vmem:[%s4079_s11 + $0x3e4] sm:$0xf]  ;;  %v3416_v55 = vld [vmem:[%s4079_s11 + $0x3e8] sm:$0xf0] }
 0x224   : > { %v1787_v60 = vpop.f32.mrf.mxu3 }
 0x225   : > { %v2342_v61 = vpack.c.bf16 %v2214_v56, %v2214_v56  ;;  %v2151_v62 = vmax.f32 %v2023_v57, 0.0  ;;  %v1788_v59 = vadd.f32 %v1787_v60, %v1458_v58  ;;  %v1300_v63 = vpop.f32.mrf.mxu0 }
 0x226   : > { %v1629_v0 = vpop.f32.mrf.mxu1 }
 0x227   : > { %2471 = vst.msk [vmem:[%s4223_s29 + $0x19c] sm:$0xf] %vm2367_vm0, %v2342_v61  ;;  %v2279_v2 = vpack.c.bf16 %v2151_v62, %v2151_v62  ;;  %v1955_v4 = vmul.f32 %v4479_v1, %v1788_v59  ;;  %v1630_v5 = vadd.f32 %v1629_v0, %v1300_v63  ;;  %v3159_v61 = vor.u32 %v3573_v47, %v3158_v46 }
 0x228   : > { %v3415_v62 = vor.u32 %v3637_v49, %v3414_v48  ;;  %v3163_v59 = vor.u32 %v3572_v52, %v3160_v53 }
 0x229   : > { %2408 = vst.msk [vmem:[%s4223_s29 + $0xa0] sm:$0xf] %vm2367_vm0, %v2279_v2  ;;  %v2087_v10 = vadd.f32 %v4487_v3, %v1955_v4  ;;  %v1892_v11 = vmul.f32 %v4479_v1, %v1630_v5  ;;  %v3419_v5 = vor.u32 %v3636_v54, %v3416_v55 }
 0x22b   : > { %v2215_v16 = vmax.f32 %v2087_v10, 0.0  ;;  %v2024_v17 = vadd.f32 %v4487_v3, %v1892_v11  ;;  %v1460_v18 = vpop.f32.mrf.mxu2 }
 0x22c   : > { %v1789_v19 = vpop.f32.mrf.mxu3 }
 0x22d   : > { %v2343_v23 = vpack.c.bf16 %v2215_v16, %v2215_v16  ;;  %v2152_v24 = vmax.f32 %v2024_v17, 0.0  ;;  %v1790_v25 = vadd.f32 %v1789_v19, %v1460_v18  ;;  %v1303_v26 = vpop.f32.mrf.mxu0 }
 0x22e   : > { %v1632_v28 = vpop.f32.mrf.mxu1 }
 0x22f   : > { %2472 = vst.msk [vmem:[%s4223_s29 + $0x1a0] sm:$0xf] %vm2367_vm0, %v2343_v23  ;;  %v2280_v29 = vpack.c.bf16 %v2152_v24, %v2152_v24  ;;  %v1956_v30 = vmul.f32 %v4479_v1, %v1790_v25  ;;  %v1633_v31 = vadd.f32 %v1632_v28, %v1303_v26  ;;  %v3166_v24 = vld [vmem:[%s4079_s11 + $0x1f0] sm:$0xf]  ;;  %v3575_v25 = vld [vmem:[%s4079_s11 + $0x1f4] sm:$0xf0] }
 0x230   : > { %1342 = vmatmul.bf16.gmra.mxu0 %v3151_v20  ;;  %1502 = vmatmul.bf16.gmra.mxu2 %v3407_v21  ;;  %v3422_v26 = vld [vmem:[%s4079_s11 + $0x3f0] sm:$0xf] }
 0x231   : > { %2409 = vst.msk [vmem:[%s4223_s29 + $0xa4] sm:$0xf] %vm2367_vm0, %v2280_v29  ;;  %v2088_v32 = vadd.f32 %v4487_v3, %v1956_v30  ;;  %v1893_v33 = vmul.f32 %v4479_v1, %v1633_v31  ;;  %1671 = vmatmul.bf16.gmra.mxu1 %v3155_v22  ;;  %1831 = vmatmul.bf16.gmra.mxu3 %v3411_v27  ;;  %v3639_v27 = vld [vmem:[%s4079_s11 + $0x3f4] sm:$0xf0]  ;;  %v3574_v30 = vld [vmem:[%s4079_s11 + $0x1f4] sm:$0xf] }
 0x232   : > { %v3168_v31 = vld [vmem:[%s4079_s11 + $0x1f8] sm:$0xf0] }
 0x233   : > { %v2216_v34 = vmax.f32 %v2088_v32, 0.0  ;;  %v2025_v35 = vadd.f32 %v4487_v3, %v1893_v33  ;;  %v1463_v36 = vpop.f32.mrf.mxu2  ;;  %v3638_v32 = vld [vmem:[%s4079_s11 + $0x3f4] sm:$0xf]  ;;  %v3424_v33 = vld [vmem:[%s4079_s11 + $0x3f8] sm:$0xf0]  ;;  %s3493_s11 = sshll.u32 (%p4025_p9), %s3909_s18, 7 }
 0x234   : > { %v1792_v37 = vpop.f32.mrf.mxu3  ;;  %s2504_s30 = ssub.s32 (%p4025_p9), 7810, %s3493_s11 }
 0x235   : > { %v2344_v38 = vpack.c.bf16 %v2216_v34, %v2216_v34  ;;  %v2153_v39 = vmax.f32 %v2025_v35, 0.0  ;;  %v1793_v40 = vadd.f32 %v1792_v37, %v1463_v36  ;;  %v1305_v41 = vpop.f32.mrf.mxu0  ;;  %p2505_p8 = scmp.lt.s32.totalorder (%p4025_p9), %s2504_s30, 128 }
 0x236   : > { %v1634_v42 = vpop.f32.mrf.mxu1 }
 0x237   : > { %2473 = vst.msk [vmem:[%s4223_s29 + $0x1a4] sm:$0xf] %vm2367_vm0, %v2344_v38  ;;  %v2281_v43 = vpack.c.bf16 %v2153_v39, %v2153_v39  ;;  %v1957_v44 = vmul.f32 %v4479_v1, %v1793_v40  ;;  %v1635_v45 = vadd.f32 %v1634_v42, %v1305_v41  ;;  %v3167_v38 = vor.u32 %v3575_v25, %v3166_v24 }
 0x238   : > { %v3423_v39 = vor.u32 %v3639_v27, %v3422_v26  ;;  %v3171_v40 = vor.u32 %v3574_v30, %v3168_v31 }
 0x239   : > { %2410 = vst.msk [vmem:[%s4223_s29 + $0xa8] sm:$0xf] %vm2367_vm0, %v2281_v43  ;;  %v2089_v50 = vadd.f32 %v4487_v3, %v1957_v44  ;;  %v1894_v51 = vmul.f32 %v4479_v1, %v1635_v45  ;;  %v3427_v45 = vor.u32 %v3638_v32, %v3424_v33 }
 0x23b   : > { %v2217_v56 = vmax.f32 %v2089_v50, 0.0  ;;  %v2026_v57 = vadd.f32 %v4487_v3, %v1894_v51  ;;  %v1465_v58 = vpop.f32.mrf.mxu2 }
 0x23c   : > { %v1794_v60 = vpop.f32.mrf.mxu3 }
 0x23d   : > { %v2345_v63 = vpack.c.bf16 %v2217_v56, %v2217_v56  ;;  %v2154_v0 = vmax.f32 %v2026_v57, 0.0  ;;  %v1795_v2 = vadd.f32 %v1794_v60, %v1465_v58  ;;  %v1308_v4 = vpop.f32.mrf.mxu0 }
 0x23e   : > { %v1637_v1 = vpop.f32.mrf.mxu1 }
 0x23f   : > { %2474 = vst.msk [vmem:[%s4223_s29 + $0x1a8] sm:$0xf] %vm2367_vm0, %v2345_v63  ;;  %v2282_v6 = vpack.c.bf16 %v2154_v0, %v2154_v0  ;;  %v1958_v3 = vmul.f32 %v4753_v7, %v1795_v2  ;;  %v1638_v8 = vadd.f32 %v1637_v1, %v1308_v4 }
 0x240   : > { %1347 = vmatmul.bf16.gmra.mxu0 %v3159_v61  ;;  %1507 = vmatmul.bf16.gmra.mxu2 %v3415_v62 }
 0x241   : > { %2411 = vst.msk [vmem:[%s4223_s29 + $0xac] sm:$0xf] %vm2367_vm0, %v2282_v6  ;;  %v2090_v10 = vadd.f32 %v4761_v9, %v1958_v3  ;;  %v1895_v11 = vmul.f32 %v4753_v7, %v1638_v8  ;;  %1676 = vmatmul.bf16.gmra.mxu1 %v3163_v59  ;;  %1836 = vmatmul.bf16.gmra.mxu3 %v3419_v5 }
 0x243   : > { %v2218_v12 = vmax.f32 %v2090_v10, 0.0  ;;  %v2027_v13 = vadd.f32 %v4761_v9, %v1895_v11  ;;  %v1468_v14 = vpop.f32.mrf.mxu2 }
 0x244   : > { %v1797_v15 = vpop.f32.mrf.mxu3 }
 0x245   : > { %v2346_v16 = vpack.c.bf16 %v2218_v12, %v2218_v12  ;;  %v2155_v17 = vmax.f32 %v2027_v13, 0.0  ;;  %v1798_v18 = vadd.f32 %v1797_v15, %v1468_v14  ;;  %v1310_v19 = vpop.f32.mrf.mxu0 }
 0x246   : > { %v1639_v20 = vpop.f32.mrf.mxu1 }
 0x247   : > { %2475 = vst.msk [vmem:[%s4223_s29 + $0x1ac] sm:$0xf] %vm2367_vm0, %v2346_v16  ;;  %v2283_v21 = vpack.c.bf16 %v2155_v17, %v2155_v17  ;;  %v1959_v22 = vmul.f32 %v4753_v7, %v1798_v18  ;;  %v1640_v23 = vadd.f32 %v1639_v20, %v1310_v19 }
 0x249   : > { %2412 = vst.msk [vmem:[%s4223_s29 + $0xb0] sm:$0xf] %vm2367_vm0, %v2283_v21  ;;  %v2091_v28 = vadd.f32 %v4761_v9, %v1959_v22  ;;  %v1896_v29 = vmul.f32 %v4753_v7, %v1640_v23 }
 0x24b   : > { %v2219_v34 = vmax.f32 %v2091_v28, 0.0  ;;  %v2028_v35 = vadd.f32 %v4761_v9, %v1896_v29  ;;  %v1470_v36 = vpop.f32.mrf.mxu2 }
 0x24c   : > { %v1799_v37 = vpop.f32.mrf.mxu3 }
 0x24d   : > { %v2347_v41 = vpack.c.bf16 %v2219_v34, %v2219_v34  ;;  %v2156_v42 = vmax.f32 %v2028_v35, 0.0  ;;  %v1800_v43 = vadd.f32 %v1799_v37, %v1470_v36  ;;  %v1313_v44 = vpop.f32.mrf.mxu0 }
 0x24e   : > { %v1642_v46 = vpop.f32.mrf.mxu1 }
 0x24f   : > { %2476 = vst.msk [vmem:[%s4223_s29 + $0x1b0] sm:$0xf] %vm2367_vm0, %v2347_v41  ;;  %v2284_v47 = vpack.c.bf16 %v2156_v42, %v2156_v42  ;;  %v1960_v48 = vmul.f32 %v4753_v7, %v1800_v43  ;;  %v1643_v49 = vadd.f32 %v1642_v46, %v1313_v44 }
 0x250   : > { %1352 = vmatmul.bf16.gmra.mxu0 %v3167_v38  ;;  %1512 = vmatmul.bf16.gmra.mxu2 %v3423_v39 }
 0x251   : > { %2413 = vst.msk [vmem:[%s4223_s29 + $0xb4] sm:$0xf] %vm2367_vm0, %v2284_v47  ;;  %v2092_v50 = vadd.f32 %v4761_v9, %v1960_v48  ;;  %v1897_v51 = vmul.f32 %v4753_v7, %v1643_v49  ;;  %1681 = vmatmul.bf16.gmra.mxu1 %v3171_v40  ;;  %1841 = vmatmul.bf16.gmra.mxu3 %v3427_v45 }
 0x253   : > { %v2220_v52 = vmax.f32 %v2092_v50, 0.0  ;;  %v2029_v53 = vadd.f32 %v4761_v9, %v1897_v51  ;;  %v1473_v54 = vpop.f32.mrf.mxu2 }
 0x254   : > { %v1802_v55 = vpop.f32.mrf.mxu3 }
 0x255   : > { %v2348_v56 = vpack.c.bf16 %v2220_v52, %v2220_v52  ;;  %v2157_v57 = vmax.f32 %v2029_v53, 0.0  ;;  %v1803_v58 = vadd.f32 %v1802_v55, %v1473_v54  ;;  %v1315_v60 = vpop.f32.mrf.mxu0 }
 0x256   : > { %v1644_v61 = vpop.f32.mrf.mxu1 }
 0x257   : > { %2477 = vst.msk [vmem:[%s4223_s29 + $0x1b4] sm:$0xf] %vm2367_vm0, %v2348_v56  ;;  %v2285_v62 = vpack.c.bf16 %v2157_v57, %v2157_v57  ;;  %v1961_v59 = vmul.f32 %v4753_v7, %v1803_v58  ;;  %v1645_v63 = vadd.f32 %v1644_v61, %v1315_v60 }
 0x259   : > { %2414 = vst.msk [vmem:[%s4223_s29 + $0xb8] sm:$0xf] %vm2367_vm0, %v2285_v62  ;;  %v2093_v0 = vadd.f32 %v4761_v9, %v1961_v59  ;;  %v1898_v2 = vmul.f32 %v4753_v7, %v1645_v63 }
 0x25b   : > { %v2221_v4 = vmax.f32 %v2093_v0, 0.0  ;;  %v2030_v5 = vadd.f32 %v4761_v9, %v1898_v2  ;;  %v1475_v1 = vpop.f32.mrf.mxu2 }
 0x25c   : > { %v1804_v6 = vpop.f32.mrf.mxu3 }
 0x25d   : > { %v2349_v3 = vpack.c.bf16 %v2221_v4, %v2221_v4  ;;  %v2158_v8 = vmax.f32 %v2030_v5, 0.0  ;;  %v1805_v10 = vadd.f32 %v1804_v6, %v1475_v1  ;;  %v1318_v11 = vpop.f32.mrf.mxu0 }
 0x25e   : > { %v1647_v12 = vpop.f32.mrf.mxu1 }
 0x25f   : > { %2478 = vst.msk [vmem:[%s4223_s29 + $0x1b8] sm:$0xf] %vm2367_vm0, %v2349_v3  ;;  %v2286_v13 = vpack.c.bf16 %v2158_v8, %v2158_v8  ;;  %v1962_v14 = vmul.f32 %v4753_v7, %v1805_v10  ;;  %v1648_v15 = vadd.f32 %v1647_v12, %v1318_v11 }
 0x261   : > { %2415 = vst.msk [vmem:[%s4223_s29 + $0xbc] sm:$0xf] %vm2367_vm0, %v2286_v13  ;;  %v2094_v16 = vadd.f32 %v4761_v9, %v1962_v14  ;;  %v1899_v17 = vmul.f32 %v4753_v7, %v1648_v15 }
 0x263   : > { %v2222_v18 = vmax.f32 %v2094_v16, 0.0  ;;  %v2031_v19 = vadd.f32 %v4761_v9, %v1899_v17  ;;  %v1478_v20 = vpop.f32.mrf.mxu2 }
 0x264   : > { %v1807_v21 = vpop.f32.mrf.mxu3 }
 0x265   : > { %v2350_v22 = vpack.c.bf16 %v2222_v18, %v2222_v18  ;;  %v2159_v23 = vmax.f32 %v2031_v19, 0.0  ;;  %v1808_v24 = vadd.f32 %v1807_v21, %v1478_v20  ;;  %v1320_v25 = vpop.f32.mrf.mxu0 }
 0x266   : > { %v1649_v26 = vpop.f32.mrf.mxu1 }
 0x267   : > { %2479 = vst.msk [vmem:[%s4223_s29 + $0x1bc] sm:$0xf] %vm2367_vm0, %v2350_v22  ;;  %v2287_v27 = vpack.c.bf16 %v2159_v23, %v2159_v23  ;;  %v1963_v28 = vmul.f32 %v4753_v7, %v1808_v24  ;;  %v1650_v29 = vadd.f32 %v1649_v26, %v1320_v25 }
 0x269   : > { %2416 = vst.msk [vmem:[%s4223_s29 + $0xc0] sm:$0xf] %vm2367_vm0, %v2287_v27  ;;  %v2095_v30 = vadd.f32 %v4761_v9, %v1963_v28  ;;  %v1900_v31 = vmul.f32 %v4753_v7, %v1650_v29 }
 0x26b   : > { %v2223_v32 = vmax.f32 %v2095_v30, 0.0  ;;  %v2032_v33 = vadd.f32 %v4761_v9, %v1900_v31  ;;  %v1480_v34 = vpop.f32.mrf.mxu2 }
 0x26c   : > { %v1809_v35 = vpop.f32.mrf.mxu3 }
 0x26d   : > { %v2351_v36 = vpack.c.bf16 %v2223_v32, %v2223_v32  ;;  %v2160_v37 = vmax.f32 %v2032_v33, 0.0  ;;  %v1810_v38 = vadd.f32 %v1809_v35, %v1480_v34  ;;  %v1323_v39 = vpop.f32.mrf.mxu0 }
 0x26e   : > { %v1652_v40 = vpop.f32.mrf.mxu1 }
 0x26f   : > { %2480 = vst.msk [vmem:[%s4223_s29 + $0x1c0] sm:$0xf] %vm2367_vm0, %v2351_v36  ;;  %v2288_v41 = vpack.c.bf16 %v2160_v37, %v2160_v37  ;;  %v1964_v42 = vmul.f32 %v4753_v7, %v1810_v38  ;;  %v1653_v43 = vadd.f32 %v1652_v40, %v1323_v39 }
 0x271   : > { %2417 = vst.msk [vmem:[%s4223_s29 + $0xc4] sm:$0xf] %vm2367_vm0, %v2288_v41  ;;  %v2096_v44 = vadd.f32 %v4761_v9, %v1964_v42  ;;  %v1901_v45 = vmul.f32 %v4753_v7, %v1653_v43 }
 0x273   : > { %v2224_v46 = vmax.f32 %v2096_v44, 0.0  ;;  %v2033_v47 = vadd.f32 %v4761_v9, %v1901_v45  ;;  %v1483_v48 = vpop.f32.mrf.mxu2 }
 0x274   : > { %v1812_v49 = vpop.f32.mrf.mxu3 }
 0x275   : > { %v2352_v50 = vpack.c.bf16 %v2224_v46, %v2224_v46  ;;  %v2161_v51 = vmax.f32 %v2033_v47, 0.0  ;;  %v1813_v52 = vadd.f32 %v1812_v49, %v1483_v48  ;;  %v1325_v53 = vpop.f32.mrf.mxu0 }
 0x276   : > { %v1654_v54 = vpop.f32.mrf.mxu1 }
 0x277   : > { %2481 = vst.msk [vmem:[%s4223_s29 + $0x1c4] sm:$0xf] %vm2367_vm0, %v2352_v50  ;;  %v2289_v55 = vpack.c.bf16 %v2161_v51, %v2161_v51  ;;  %v1965_v56 = vmul.f32 %v4753_v7, %v1813_v52  ;;  %v1655_v57 = vadd.f32 %v1654_v54, %v1325_v53 }
 0x279   : > { %2418 = vst.msk [vmem:[%s4223_s29 + $0xc8] sm:$0xf] %vm2367_vm0, %v2289_v55  ;;  %v2097_v58 = vadd.f32 %v4761_v9, %v1965_v56  ;;  %v1902_v60 = vmul.f32 %v4753_v7, %v1655_v57 }
 0x27b   : > { %v2225_v61 = vmax.f32 %v2097_v58, 0.0  ;;  %v2034_v62 = vadd.f32 %v4761_v9, %v1902_v60  ;;  %v1485_v59 = vpop.f32.mrf.mxu2 }
 0x27c   : > { %v1814_v63 = vpop.f32.mrf.mxu3 }
 0x27d   : > { %v2353_v0 = vpack.c.bf16 %v2225_v61, %v2225_v61  ;;  %v2162_v2 = vmax.f32 %v2034_v62, 0.0  ;;  %v1815_v4 = vadd.f32 %v1814_v63, %v1485_v59  ;;  %v1328_v5 = vpop.f32.mrf.mxu0 }
 0x27e   : > { %v1657_v1 = vpop.f32.mrf.mxu1 }
 0x27f   : > { %2482 = vst.msk [vmem:[%s4223_s29 + $0x1c8] sm:$0xf] %vm2367_vm0, %v2353_v0  ;;  %v2290_v6 = vpack.c.bf16 %v2162_v2, %v2162_v2  ;;  %v1966_v3 = vmul.f32 %v4753_v7, %v1815_v4  ;;  %v1658_v8 = vadd.f32 %v1657_v1, %v1328_v5 }
 0x281   : > { %2419 = vst.msk [vmem:[%s4223_s29 + $0xcc] sm:$0xf] %vm2367_vm0, %v2290_v6  ;;  %v2098_v10 = vadd.f32 %v4761_v9, %v1966_v3  ;;  %v1903_v11 = vmul.f32 %v4753_v7, %v1658_v8 }
 0x283   : > { %v2226_v12 = vmax.f32 %v2098_v10, 0.0  ;;  %v2035_v13 = vadd.f32 %v4761_v9, %v1903_v11  ;;  %v1488_v14 = vpop.f32.mrf.mxu2 }
 0x284   : > { %v1817_v15 = vpop.f32.mrf.mxu3 }
 0x285   : > { %v2354_v16 = vpack.c.bf16 %v2226_v12, %v2226_v12  ;;  %v2163_v17 = vmax.f32 %v2035_v13, 0.0  ;;  %v1818_v18 = vadd.f32 %v1817_v15, %v1488_v14  ;;  %v1330_v19 = vpop.f32.mrf.mxu0 }
 0x286   : > { %v1659_v20 = vpop.f32.mrf.mxu1 }
 0x287   : > { %2483 = vst.msk [vmem:[%s4223_s29 + $0x1cc] sm:$0xf] %vm2367_vm0, %v2354_v16  ;;  %v2291_v21 = vpack.c.bf16 %v2163_v17, %v2163_v17  ;;  %v1967_v22 = vmul.f32 %v4753_v7, %v1818_v18  ;;  %v1660_v23 = vadd.f32 %v1659_v20, %v1330_v19 }
 0x289   : > { %2420 = vst.msk [vmem:[%s4223_s29 + $0xd0] sm:$0xf] %vm2367_vm0, %v2291_v21  ;;  %v2099_v24 = vadd.f32 %v4761_v9, %v1967_v22  ;;  %v1904_v25 = vmul.f32 %v4753_v7, %v1660_v23 }
 0x28b   : > { %v2227_v26 = vmax.f32 %v2099_v24, 0.0  ;;  %v2036_v27 = vadd.f32 %v4761_v9, %v1904_v25  ;;  %v1490_v28 = vpop.f32.mrf.mxu2 }
 0x28c   : > { %v1819_v29 = vpop.f32.mrf.mxu3 }
 0x28d   : > { %v2355_v30 = vpack.c.bf16 %v2227_v26, %v2227_v26  ;;  %v2164_v31 = vmax.f32 %v2036_v27, 0.0  ;;  %v1820_v32 = vadd.f32 %v1819_v29, %v1490_v28  ;;  %v1333_v33 = vpop.f32.mrf.mxu0 }
 0x28e   : > { %v1662_v34 = vpop.f32.mrf.mxu1 }
 0x28f   : > { %2484 = vst.msk [vmem:[%s4223_s29 + $0x1d0] sm:$0xf] %vm2367_vm0, %v2355_v30  ;;  %v2292_v35 = vpack.c.bf16 %v2164_v31, %v2164_v31  ;;  %v1968_v36 = vmul.f32 %v4753_v7, %v1820_v32  ;;  %v1663_v37 = vadd.f32 %v1662_v34, %v1333_v33 }
 0x291   : > { %2421 = vst.msk [vmem:[%s4223_s29 + $0xd4] sm:$0xf] %vm2367_vm0, %v2292_v35  ;;  %v2100_v38 = vadd.f32 %v4761_v9, %v1968_v36  ;;  %v1905_v39 = vmul.f32 %v4753_v7, %v1663_v37 }
 0x293   : > { %v2228_v40 = vmax.f32 %v2100_v38, 0.0  ;;  %v2037_v41 = vadd.f32 %v4761_v9, %v1905_v39  ;;  %v1493_v42 = vpop.f32.mrf.mxu2 }
 0x294   : > { %v1822_v43 = vpop.f32.mrf.mxu3 }
 0x295   : > { %v2356_v44 = vpack.c.bf16 %v2228_v40, %v2228_v40  ;;  %v2165_v45 = vmax.f32 %v2037_v41, 0.0  ;;  %v1823_v46 = vadd.f32 %v1822_v43, %v1493_v42  ;;  %v1335_v47 = vpop.f32.mrf.mxu0 }
 0x296   : > { %v1664_v48 = vpop.f32.mrf.mxu1 }
 0x297   : > { %2485 = vst.msk [vmem:[%s4223_s29 + $0x1d4] sm:$0xf] %vm2367_vm0, %v2356_v44  ;;  %v2293_v49 = vpack.c.bf16 %v2165_v45, %v2165_v45  ;;  %v1969_v50 = vmul.f32 %v4753_v7, %v1823_v46  ;;  %v1665_v51 = vadd.f32 %v1664_v48, %v1335_v47 }
 0x299   : > { %2422 = vst.msk [vmem:[%s4223_s29 + $0xd8] sm:$0xf] %vm2367_vm0, %v2293_v49  ;;  %v2101_v52 = vadd.f32 %v4761_v9, %v1969_v50  ;;  %v1906_v53 = vmul.f32 %v4753_v7, %v1665_v51 }
 0x29b   : > { %v2229_v54 = vmax.f32 %v2101_v52, 0.0  ;;  %v2038_v55 = vadd.f32 %v4761_v9, %v1906_v53  ;;  %v1495_v56 = vpop.f32.mrf.mxu2 }
 0x29c   : > { %v1824_v57 = vpop.f32.mrf.mxu3 }
 0x29d   : > { %v2357_v58 = vpack.c.bf16 %v2229_v54, %v2229_v54  ;;  %v2166_v60 = vmax.f32 %v2038_v55, 0.0  ;;  %v1825_v61 = vadd.f32 %v1824_v57, %v1495_v56  ;;  %v1338_v62 = vpop.f32.mrf.mxu0 }
 0x29e   : > { %v1667_v59 = vpop.f32.mrf.mxu1 }
 0x29f   : > { %2486 = vst.msk [vmem:[%s4223_s29 + $0x1d8] sm:$0xf] %vm2367_vm0, %v2357_v58  ;;  %v2294_v63 = vpack.c.bf16 %v2166_v60, %v2166_v60  ;;  %v1970_v0 = vmul.f32 %v4753_v7, %v1825_v61  ;;  %v1668_v2 = vadd.f32 %v1667_v59, %v1338_v62 }
 0x2a1   : > { %2423 = vst.msk [vmem:[%s4223_s29 + $0xdc] sm:$0xf] %vm2367_vm0, %v2294_v63  ;;  %v2102_v4 = vadd.f32 %v4761_v9, %v1970_v0  ;;  %v1907_v5 = vmul.f32 %v4753_v7, %v1668_v2 }
 0x2a3   : > { %v2230_v1 = vmax.f32 %v2102_v4, 0.0  ;;  %v2039_v6 = vadd.f32 %v4761_v9, %v1907_v5  ;;  %v1498_v3 = vpop.f32.mrf.mxu2 }
 0x2a4   : > { %v1827_v8 = vpop.f32.mrf.mxu3 }
 0x2a5   : > { %v2358_v10 = vpack.c.bf16 %v2230_v1, %v2230_v1  ;;  %v2167_v11 = vmax.f32 %v2039_v6, 0.0  ;;  %v1828_v12 = vadd.f32 %v1827_v8, %v1498_v3  ;;  %v1340_v13 = vpop.f32.mrf.mxu0 }
 0x2a6   : > { %v1669_v14 = vpop.f32.mrf.mxu1 }
 0x2a7   : > { %2487 = vst.msk [vmem:[%s4223_s29 + $0x1dc] sm:$0xf] %vm2367_vm0, %v2358_v10  ;;  %v2295_v15 = vpack.c.bf16 %v2167_v11, %v2167_v11  ;;  %v1971_v16 = vmul.f32 %v4753_v7, %v1828_v12  ;;  %v1670_v17 = vadd.f32 %v1669_v14, %v1340_v13 }
 0x2a9   : > { %2424 = vst.msk [vmem:[%s4223_s29 + $0xe0] sm:$0xf] %vm2367_vm0, %v2295_v15  ;;  %v2103_v18 = vadd.f32 %v4761_v9, %v1971_v16  ;;  %v1908_v19 = vmul.f32 %v4753_v7, %v1670_v17 }
 0x2ab   : > { %v2231_v20 = vmax.f32 %v2103_v18, 0.0  ;;  %v2040_v21 = vadd.f32 %v4761_v9, %v1908_v19  ;;  %v1500_v22 = vpop.f32.mrf.mxu2 }
 0x2ac   : > { %v1829_v23 = vpop.f32.mrf.mxu3 }
 0x2ad   : > { %v2359_v24 = vpack.c.bf16 %v2231_v20, %v2231_v20  ;;  %v2168_v25 = vmax.f32 %v2040_v21, 0.0  ;;  %v1830_v26 = vadd.f32 %v1829_v23, %v1500_v22  ;;  %v1343_v27 = vpop.f32.mrf.mxu0 }
 0x2ae   : > { %v1672_v28 = vpop.f32.mrf.mxu1 }
 0x2af   : > { %2488 = vst.msk [vmem:[%s4223_s29 + $0x1e0] sm:$0xf] %vm2367_vm0, %v2359_v24  ;;  %v2296_v29 = vpack.c.bf16 %v2168_v25, %v2168_v25  ;;  %v1972_v30 = vmul.f32 %v4753_v7, %v1830_v26  ;;  %v1673_v31 = vadd.f32 %v1672_v28, %v1343_v27 }
 0x2b1   : > { %2425 = vst.msk [vmem:[%s4223_s29 + $0xe4] sm:$0xf] %vm2367_vm0, %v2296_v29  ;;  %v2104_v32 = vadd.f32 %v4761_v9, %v1972_v30  ;;  %v1909_v33 = vmul.f32 %v4753_v7, %v1673_v31 }
 0x2b3   : > { %v2232_v34 = vmax.f32 %v2104_v32, 0.0  ;;  %v2041_v35 = vadd.f32 %v4761_v9, %v1909_v33  ;;  %v1503_v36 = vpop.f32.mrf.mxu2 }
 0x2b4   : > { %v1832_v37 = vpop.f32.mrf.mxu3 }
 0x2b5   : > { %v2360_v38 = vpack.c.bf16 %v2232_v34, %v2232_v34  ;;  %v2169_v39 = vmax.f32 %v2041_v35, 0.0  ;;  %v1833_v40 = vadd.f32 %v1832_v37, %v1503_v36  ;;  %v1345_v41 = vpop.f32.mrf.mxu0 }
 0x2b6   : > { %v1674_v42 = vpop.f32.mrf.mxu1 }
 0x2b7   : > { %2489 = vst.msk [vmem:[%s4223_s29 + $0x1e4] sm:$0xf] %vm2367_vm0, %v2360_v38  ;;  %v2297_v43 = vpack.c.bf16 %v2169_v39, %v2169_v39  ;;  %v1973_v44 = vmul.f32 %v4753_v7, %v1833_v40  ;;  %v1675_v45 = vadd.f32 %v1674_v42, %v1345_v41 }
 0x2b9   : > { %2426 = vst.msk [vmem:[%s4223_s29 + $0xe8] sm:$0xf] %vm2367_vm0, %v2297_v43  ;;  %v2105_v46 = vadd.f32 %v4761_v9, %v1973_v44  ;;  %v1910_v47 = vmul.f32 %v4753_v7, %v1675_v45 }
 0x2bb   : > { %v2233_v48 = vmax.f32 %v2105_v46, 0.0  ;;  %v2042_v49 = vadd.f32 %v4761_v9, %v1910_v47  ;;  %v1505_v50 = vpop.f32.mrf.mxu2 }
 0x2bc   : > { %v1834_v51 = vpop.f32.mrf.mxu3 }
 0x2bd   : > { %v2361_v52 = vpack.c.bf16 %v2233_v48, %v2233_v48  ;;  %v2170_v53 = vmax.f32 %v2042_v49, 0.0  ;;  %v1835_v54 = vadd.f32 %v1834_v51, %v1505_v50  ;;  %v1348_v55 = vpop.f32.mrf.mxu0 }
 0x2be   : > { %v1677_v56 = vpop.f32.mrf.mxu1 }
 0x2bf   : > { %2490 = vst.msk [vmem:[%s4223_s29 + $0x1e8] sm:$0xf] %vm2367_vm0, %v2361_v52  ;;  %v2298_v57 = vpack.c.bf16 %v2170_v53, %v2170_v53  ;;  %v1974_v58 = vmul.f32 %v4753_v7, %v1835_v54  ;;  %v1678_v60 = vadd.f32 %v1677_v56, %v1348_v55 }
 0x2c1   : > { %2427 = vst.msk [vmem:[%s4223_s29 + $0xec] sm:$0xf] %vm2367_vm0, %v2298_v57  ;;  %v2106_v61 = vadd.f32 %v4761_v9, %v1974_v58  ;;  %v1911_v62 = vmul.f32 %v4753_v7, %v1678_v60 }
 0x2c3   : > { %v2234_v59 = vmax.f32 %v2106_v61, 0.0  ;;  %v2043_v63 = vadd.f32 %v4761_v9, %v1911_v62  ;;  %v1508_v0 = vpop.f32.mrf.mxu2 }
 0x2c4   : > { %v1837_v2 = vpop.f32.mrf.mxu3 }
 0x2c5   : > { %v2362_v4 = vpack.c.bf16 %v2234_v59, %v2234_v59  ;;  %v2171_v5 = vmax.f32 %v2043_v63, 0.0  ;;  %v1838_v1 = vadd.f32 %v1837_v2, %v1508_v0  ;;  %v1350_v6 = vpop.f32.mrf.mxu0 }
 0x2c6   : > { %v1679_v3 = vpop.f32.mrf.mxu1 }
 0x2c7   : > { %2491 = vst.msk [vmem:[%s4223_s29 + $0x1ec] sm:$0xf] %vm2367_vm0, %v2362_v4  ;;  %v2299_v8 = vpack.c.bf16 %v2171_v5, %v2171_v5  ;;  %v1975_v10 = vmul.f32 %v4753_v7, %v1838_v1  ;;  %v1680_v11 = vadd.f32 %v1679_v3, %v1350_v6 }
 0x2c9   : > { %2428 = vst.msk [vmem:[%s4223_s29 + $0xf0] sm:$0xf] %vm2367_vm0, %v2299_v8  ;;  %v2107_v12 = vadd.f32 %v4761_v9, %v1975_v10  ;;  %v1912_v13 = vmul.f32 %v4753_v7, %v1680_v11 }
 0x2cb   : > { %v2235_v14 = vmax.f32 %v2107_v12, 0.0  ;;  %v2044_v15 = vadd.f32 %v4761_v9, %v1912_v13  ;;  %v1510_v16 = vpop.f32.mrf.mxu2 }
 0x2cc   : > { %v1839_v17 = vpop.f32.mrf.mxu3 }
 0x2cd   : > { %v2363_v18 = vpack.c.bf16 %v2235_v14, %v2235_v14  ;;  %v2172_v19 = vmax.f32 %v2044_v15, 0.0  ;;  %v1840_v20 = vadd.f32 %v1839_v17, %v1510_v16  ;;  %v1353_v21 = vpop.f32.mrf.mxu0 }
 0x2ce   : > { %v1682_v22 = vpop.f32.mrf.mxu1 }
 0x2cf   : > { %2492 = vst.msk [vmem:[%s4223_s29 + $0x1f0] sm:$0xf] %vm2367_vm0, %v2363_v18  ;;  %v2300_v23 = vpack.c.bf16 %v2172_v19, %v2172_v19  ;;  %v1976_v24 = vmul.f32 %v4753_v7, %v1840_v20  ;;  %v1683_v25 = vadd.f32 %v1682_v22, %v1353_v21 }
 0x2d1   : > { %2429 = vst.msk [vmem:[%s4223_s29 + $0xf4] sm:$0xf] %vm2367_vm0, %v2300_v23  ;;  %v2108_v26 = vadd.f32 %v4761_v9, %v1976_v24  ;;  %v1913_v27 = vmul.f32 %v4753_v7, %v1683_v25 }
 0x2d3   : > { %v2236_v28 = vmax.f32 %v2108_v26, 0.0  ;;  %v2045_v29 = vadd.f32 %v4761_v9, %v1913_v27  ;;  %v1513_v30 = vpop.f32.mrf.mxu2 }
 0x2d4   : > { %v1842_v31 = vpop.f32.mrf.mxu3 }
 0x2d5   : > { %v2364_v32 = vpack.c.bf16 %v2236_v28, %v2236_v28  ;;  %v2173_v33 = vmax.f32 %v2045_v29, 0.0  ;;  %v1843_v34 = vadd.f32 %v1842_v31, %v1513_v30  ;;  %v1355_v35 = vpop.f32.mrf.mxu0 }
 0x2d6   : > { %v1684_v36 = vpop.f32.mrf.mxu1 }
 0x2d7   : > { %2493 = vst.msk [vmem:[%s4223_s29 + $0x1f4] sm:$0xf] %vm2367_vm0, %v2364_v32  ;;  %v2301_v37 = vpack.c.bf16 %v2173_v33, %v2173_v33  ;;  %v1977_v38 = vmul.f32 %v4753_v7, %v1843_v34  ;;  %v1685_v39 = vadd.f32 %v1684_v36, %v1355_v35 }
 0x2d9   : > { %2430 = vst.msk [vmem:[%s4223_s29 + $0xf8] sm:$0xf] %vm2367_vm0, %v2301_v37  ;;  %v2109_v40 = vadd.f32 %v4761_v9, %v1977_v38  ;;  %v1914_v41 = vmul.f32 %v4753_v7, %v1685_v39 }
 0x2db   : > { %v2237_v42 = vmax.f32 %v2109_v40, 0.0  ;;  %v2046_v43 = vadd.f32 %v4761_v9, %v1914_v41  ;;  %v1515_v44 = vpop.f32.mrf.mxu2 }
 0x2dc   : > { %v1844_v45 = vpop.f32.mrf.mxu3 }
 0x2dd   : > { %v2365_v46 = vpack.c.bf16 %v2237_v42, %v2237_v42  ;;  %v2174_v47 = vmax.f32 %v2046_v43, 0.0  ;;  %v1845_v48 = vadd.f32 %v1844_v45, %v1515_v44 }
 0x2df   : > { %2494 = vst.msk [vmem:[%s4223_s29 + $0x1f8] sm:$0xf] %vm2367_vm0, %v2365_v46  ;;  %v2302_v49 = vpack.c.bf16 %v2174_v47, %v2174_v47  ;;  %v1978_v50 = vmul.f32 %v4753_v7, %v1845_v48 }
 0x2e1   : > { %2431 = vst.msk [vmem:[%s4223_s29 + $0xfc] sm:$0xf] %vm2367_vm0, %v2302_v49  ;;  %v2110_v51 = vadd.f32 %v4761_v9, %v1978_v50 }
 0x2e3   : > { %v2238_v52 = vmax.f32 %v2110_v51, 0.0  ;;  %2502 = sbr.rel (!%p4025_p9) target bundleno = 808 (0x328), region = 44 }
 0x2e5   : > { %v2366_v53 = vpack.c.bf16 %v2238_v52, %v2238_v52 }
 0x2e7   : > { %2495 = vst.msk [vmem:[%s4223_s29 + $0x1fc] sm:$0xf] %vm2367_vm0, %v2366_v53 }
 0x2e8   : > { %s5107_s30 = smov (!%p2505_p8, %s2504_s30), 128 }
 0x2e9   : > { %s3494_s21 = sshll.u32 %s5107_s30, 2 }
 0x2ea   : > { %p3497_p12 = scmp.eq.s32.totalorder %s3494_s21, 0 }
 0x2eb   : > { %s4947_s27 = sshrl.u32 (!%p3497_p12), %s5107_s30, 5 }
 0x2ec   : > { %2514 = sbr.rel (%p3497_p12) target bundleno = 808 (0x328), region = 48  ;;  %p3498_p9 = scmp.le.s32.totalorder (!%p3497_p12), %s4947_s27, 0 }
 0x2f1   : > { %2815 = sbr.rel (%p3498_p9) target bundleno = 791 (0x317), region = 135  ;;  %s5092_s18 = smov (!%p3498_p9), %s4941_s9 }
 0x2f2   : > { %s5093_s23 = smov (!%p3498_p9), %s4223_s29  ;;  %s4956_s24 = smov (!%p3498_p9), 0  }
 0x2f3   : > { %s4958_s7 = smov (!%p3498_p9), 0  }
 0x2f6 LB: >> { %v2531_v7 = vld [vmem:[%s3925_s23] sm:$0xf]  ;;  %v2533_v9 = vld [vmem:[%s3925_s23 + $0x4] sm:$0xf]  ;;  %v2535_v54 = vld [vmem:[%s3925_s23 + $0x8] sm:$0xf]  ;;  %s3933_s7 = sphi %s4958_s7, %s2525_s7   ;;  %s3929_s24 = sphi %s4956_s24, %s5096_s24   ;;  %s3925_s23 = sphi %s5093_s23, %s5095_s23   ;;  %s3921_s18 = sphi %s5092_s18, %s5094_s18  }
 0x2f7   : >> { %2532 = vst [vmem:[%s3921_s18] sm:$0xf] %v2531_v7  ;;  %v2537_v55 = vld [vmem:[%s3925_s23 + $0xc] sm:$0xf]  ;;  %v2539_v56 = vld [vmem:[%s3925_s23 + $0x10] sm:$0xf]  ;;  %s2595_s8 = sadd.s32 1, %s3929_s24 }
 0x2f8   : >> { %2534 = vst [vmem:[%s3921_s18 + $0x4] sm:$0xf] %v2533_v9  ;;  %v2541_v57 = vld [vmem:[%s3925_s23 + $0x14] sm:$0xf]  ;;  %v2543_v58 = vld [vmem:[%s3925_s23 + $0x18] sm:$0xf]  ;;  %p2596_p1 = scmp.ge.s32.totalorder %s2595_s8, %s4947_s27 }
 0x2f9   : >> { %2536 = vst [vmem:[%s3921_s18 + $0x8] sm:$0xf] %v2535_v54  ;;  %v2545_v60 = vld [vmem:[%s3925_s23 + $0x1c] sm:$0xf]  ;;  %v2547_v61 = vld [vmem:[%s3925_s23 + $0x20] sm:$0xf] }
 0x2fa   : >> { %2538 = vst [vmem:[%s3921_s18 + $0xc] sm:$0xf] %v2537_v55  ;;  %v2549_v62 = vld [vmem:[%s3925_s23 + $0x24] sm:$0xf]  ;;  %v2551_v59 = vld [vmem:[%s3925_s23 + $0x28] sm:$0xf] }
 0x2fb   : >> { %2540 = vst [vmem:[%s3921_s18 + $0x10] sm:$0xf] %v2539_v56  ;;  %v2553_v63 = vld [vmem:[%s3925_s23 + $0x2c] sm:$0xf]  ;;  %v2555_v0 = vld [vmem:[%s3925_s23 + $0x30] sm:$0xf] }
 0x2fc   : >> { %2542 = vst [vmem:[%s3921_s18 + $0x14] sm:$0xf] %v2541_v57  ;;  %v2557_v2 = vld [vmem:[%s3925_s23 + $0x34] sm:$0xf]  ;;  %v2559_v4 = vld [vmem:[%s3925_s23 + $0x38] sm:$0xf] }
 0x2fd   : >> { %2544 = vst [vmem:[%s3921_s18 + $0x18] sm:$0xf] %v2543_v58  ;;  %v2561_v5 = vld [vmem:[%s3925_s23 + $0x3c] sm:$0xf]  ;;  %v2563_v1 = vld [vmem:[%s3925_s23 + $0x40] sm:$0xf] }
 0x2fe   : >> { %2546 = vst [vmem:[%s3921_s18 + $0x1c] sm:$0xf] %v2545_v60  ;;  %v2565_v6 = vld [vmem:[%s3925_s23 + $0x44] sm:$0xf]  ;;  %s5109_s8 = smov (%p2596_p1, %s2595_s8), 0  ;;  %s2525_s7 = sadd.s32 1, %s3933_s7  }
 0x2ff   : >> { %2548 = vst [vmem:[%s3921_s18 + $0x20] sm:$0xf] %v2547_v61  ;;  %v2567_v3 = vld [vmem:[%s3925_s23 + $0x48] sm:$0xf]  ;;  %v2569_v8 = vld [vmem:[%s3925_s23 + $0x4c] sm:$0xf]  ;;  %p2524_p2 = scmp.ge.s32.totalorder %s2525_s7, %s4947_s27  ;;  %s5096_s24 = smov %s5109_s8 }
 0x300   : >> { %2550 = vst [vmem:[%s3921_s18 + $0x24] sm:$0xf] %v2549_v62  ;;  %s3499_s10 = sshll.u32 %s5109_s8, 7  ;;  %v2571_v10 = vld [vmem:[%s3925_s23 + $0x50] sm:$0xf] }
 0x301   : >> { %2552 = vst [vmem:[%s3921_s18 + $0x28] sm:$0xf] %v2551_v59  ;;  %s5017_s25 = scalar_lea.vmem %s4223_s29, %s3499_s10 [#allocation4]   ;;  %s2601_s12 = scalar_lea.vmem %s4941_s9, %s3499_s10   ;;  %v2573_v11 = vld [vmem:[%s3925_s23 + $0x54] sm:$0xf]  ;;  %v2575_v12 = vld [vmem:[%s3925_s23 + $0x58] sm:$0xf] }
 0x302   : >> { %2554 = vst [vmem:[%s3921_s18 + $0x2c] sm:$0xf] %v2553_v63  ;;  %v2577_v13 = vld [vmem:[%s3925_s23 + $0x5c] sm:$0xf]  ;;  %v2579_v14 = vld [vmem:[%s3925_s23 + $0x60] sm:$0xf] }
 0x303   : >> { %2556 = vst [vmem:[%s3921_s18 + $0x30] sm:$0xf] %v2555_v0  ;;  %v2581_v15 = vld [vmem:[%s3925_s23 + $0x64] sm:$0xf]  ;;  %v2583_v16 = vld [vmem:[%s3925_s23 + $0x68] sm:$0xf] }
 0x304   : >> { %2558 = vst [vmem:[%s3921_s18 + $0x34] sm:$0xf] %v2557_v2  ;;  %v2585_v17 = vld [vmem:[%s3925_s23 + $0x6c] sm:$0xf]  ;;  %v2587_v18 = vld [vmem:[%s3925_s23 + $0x70] sm:$0xf] }
 0x305   : >> { %2560 = vst [vmem:[%s3921_s18 + $0x38] sm:$0xf] %v2559_v4  ;;  %v2589_v19 = vld [vmem:[%s3925_s23 + $0x74] sm:$0xf]  ;;  %v2591_v20 = vld [vmem:[%s3925_s23 + $0x78] sm:$0xf] }
 0x306   : >> { %2562 = vst [vmem:[%s3921_s18 + $0x3c] sm:$0xf] %v2561_v5  ;;  %v2593_v21 = vld [vmem:[%s3925_s23 + $0x7c] sm:$0xf]  ;;  %s5095_s23 = smov %s5017_s25 }
 0x307   : >> { %2564 = vst [vmem:[%s3921_s18 + $0x40] sm:$0xf] %v2563_v1 }
 0x308   : >> { %2566 = vst [vmem:[%s3921_s18 + $0x44] sm:$0xf] %v2565_v6 }
 0x309   : >> { %2568 = vst [vmem:[%s3921_s18 + $0x48] sm:$0xf] %v2567_v3 }
 0x30a   : >> { %2570 = vst [vmem:[%s3921_s18 + $0x4c] sm:$0xf] %v2569_v8 }
 0x30b   : >> { %2572 = vst [vmem:[%s3921_s18 + $0x50] sm:$0xf] %v2571_v10 }
 0x30c   : >> { %2574 = vst [vmem:[%s3921_s18 + $0x54] sm:$0xf] %v2573_v11 }
 0x30d   : >> { %2576 = vst [vmem:[%s3921_s18 + $0x58] sm:$0xf] %v2575_v12 }
 0x30e   : >> { %2578 = vst [vmem:[%s3921_s18 + $0x5c] sm:$0xf] %v2577_v13 }
 0x30f   : >> { %2580 = vst [vmem:[%s3921_s18 + $0x60] sm:$0xf] %v2579_v14 }
 0x310   : >> { %2582 = vst [vmem:[%s3921_s18 + $0x64] sm:$0xf] %v2581_v15 }
 0x311   : >> { %2584 = vst [vmem:[%s3921_s18 + $0x68] sm:$0xf] %v2583_v16 }
 0x312   : >> { %2586 = vst [vmem:[%s3921_s18 + $0x6c] sm:$0xf] %v2585_v17  ;;  %2527 = sbr.rel (!%p2524_p2) target bundleno = 758 (0x2f6), region = 141 }
 0x313   : >> { %2588 = vst [vmem:[%s3921_s18 + $0x70] sm:$0xf] %v2587_v18 }
 0x314   : >> { %2590 = vst [vmem:[%s3921_s18 + $0x74] sm:$0xf] %v2589_v19 }
 0x315   : >> { %2592 = vst [vmem:[%s3921_s18 + $0x78] sm:$0xf] %v2591_v20 }
 0x316   : >> { %2594 = vst [vmem:[%s3921_s18 + $0x7c] sm:$0xf] %v2593_v21  ;;  %s5094_s18 = smov %s2601_s12 }
 0x317 PF: > { %s5058_s13 = sand.u32 31, %s5107_s30   ;;  %s3657_s14 = sshll.u32 %s4947_s27, 7 }
 0x318   : > { %s2606_s15 = scalar_lea.vmem %s4223_s29, %s3657_s14 [#allocation4]   ;;  %s2608_s11 = scalar_lea.vmem %s4941_s9, %s3657_s14  }
 0x319   : > { %p3504_p3 = scmp.le.s32.totalorder %s5058_s13, 0 }
 0x31a   : > { %s3935_s28 = smov (!%p3504_p3), %s2608_s11   ;;  %s3939_s6 = smov (!%p3504_p3), %s2606_s15  }
 0x31b   : > { %2829 = sbr.rel (%p3504_p3) target bundleno = 808 (0x328), region = 146  ;;  %s3943_s5 = smov (!%p3504_p3), 0  }
 0x31c   : > { %s3947_s21 = smov (!%p3504_p3), 0  }
 0x320 LB: >> { %v2618_v22 = vld [vmem:[%s3941_s6] sm:$0xf]  ;;  %s2620_s30 = sadd.s32 1, %s3945_s5  ;;  %s2612_s21 = sadd.s32 1, %s3949_s21   ;;  %s3949_s21 = sphi %s3947_s21, %s2612_s21   ;;  %s3945_s5 = sphi %s3943_s5, %s3944_s5   ;;  %s3941_s6 = sphi %s3939_s6, %s2625_s6   ;;  %s3937_s28 = sphi %s3935_s28, %s2626_s28  }
 0x321   : >> { %2619 = vst [vmem:[%s3937_s28] sm:$0xf] %v2618_v22  ;;  %p2621_p4 = scmp.ge.s32.totalorder %s2620_s30, %s5058_s13  ;;  %p2611_p5 = scmp.ge.s32.totalorder %s2612_s21, %s5058_s13 }
 0x323   : >> { %s5111_s30 = smov (%p2621_p4, %s2620_s30), 0  ;;  %2614 = sbr.rel (!%p2611_p5) target bundleno = 800 (0x320), region = 152 }
 0x324   : >> { %s3505_s29 = sshll.u32 %s5111_s30, 2  ;;  %s3944_s5 = smov %s5111_s30  }
 0x325   : >> { %s2625_s6 = scalar_lea.vmem %s2606_s15, %s3505_s29 [#allocation4]   ;;  %s2626_s28 = scalar_lea.vmem %s2608_s11, %s3505_s29  }
 0x328 PF: > { %s17_s20 = sadd.s32 1, %s3917_s20   ;;  %s5097_s15 = smov %s3901_s16 }
 0x329   : > { %p14_p6 = scmp.ge.s32.totalorder %s17_s20, 64   ;;  %s5098_s16 = smov %s3905_s17 }
 0x32a   : > { %s5099_s17 = smov %s4023_s26  ;;  %s5100_s18 = smov %s3913_s19 }
 0x32b   : > { %s5101_s19 = smov %s5103_s22  ;;  %16 = sbr.rel (!%p14_p6) target bundleno = 4 (0x4), region = 163 }
 0x330   :  { %2750 = vsyncpa [#allocation3], 1 }
 0x331   :  { %2752 = vsyncpa [#allocation3 + $0x1], 1 }

</bundles_post_ra>
